<compile_context>
chip_gen: v6e
topology: v6e:2x2x1
jax: 0.10.0
libtpu: 0.0.40
codegen_flags: <defaults>
</compile_context>

<pallas_src>
import functools

import jax
import jax.numpy as jnp
from jax import lax
from jax.experimental import pallas as pl
from jax.experimental.pallas import tpu as pltpu

BN_EPS = 1e-5
K1, K2, K3 = 8, 5, 3
C1, C2, C3 = 128, 256, 128


def _tap_accumulate(h, w_ref, l_out, n_taps, c_in, tn):
    """sum_k dot(h[:, k:k+l_out, :] flattened, w[k]); one MXU matmul per tap (K=c_in)."""
    acc = None
    for k in range(n_taps):
        tap = h[:, k:k + l_out, :].reshape(tn * l_out, c_in)
        y = jnp.dot(tap, w_ref[k * c_in:(k + 1) * c_in, :],
                    preferred_element_type=jnp.float32)
        acc = y if acc is None else acc + y
    return acc


def fcn_kernel(x_ref, w1_ref, b1_ref, w2_ref, b2_ref, w3_ref, b3_ref,
               wo_ref, bo_ref, out_ref, *,
               l2c, l3c, l3_true, per_tap_l2, compute_dtype):
    tn, l1c, k1c = x_ref.shape

    # ---- layer 1: flatten batch*positions into M, one MXU matmul (K = K1*Cin) ----
    x2d = x_ref[...].reshape(tn * l1c, k1c)
    h1 = jnp.dot(x2d, w1_ref[...], preferred_element_type=jnp.float32)
    h1 = jnp.maximum(h1 + b1_ref[...], 0.0)
    h1 = h1.astype(compute_dtype).reshape(tn, l1c, C1)

    # ---- layer 2 ----
    if per_tap_l2:
        # v5e: 5 matmuls with K=128 cost the same MXU passes as one K=640 matmul,
        # so skip the concat (and its relayouts / working-set bloat).
        h2 = _tap_accumulate(h1, w2_ref, l2c, K2, C1, tn)
    else:
        # v6e/v7x: lane-aligned 128-wide concat -> one matmul with K=640.
        p2 = jnp.concatenate([h1[:, k:k + l2c, :] for k in range(K2)],
                             axis=-1).reshape(tn * l2c, K2 * C1)
        h2 = jnp.dot(p2, w2_ref[...], preferred_element_type=jnp.float32)
    h2 = jnp.maximum(h2 + b2_ref[...], 0.0)
    h2 = h2.astype(compute_dtype).reshape(tn, l2c, C2)

    # ---- layer 3: per-tap accumulation (K=256 per tap), no 3x duplicate of h2 ----
    h3 = _tap_accumulate(h2, w3_ref, l3c, K3, C2, tn)
    h3 = jnp.maximum(h3 + b3_ref[...], 0.0).reshape(tn, l3c, C3)

    # ---- global average pool over the true (unpadded) L3 positions ----
    pooled = jnp.sum(h3[:, :l3_true, :], axis=1) * (1.0 / l3_true)      # (TN, C3) f32

    # ---- linear head -> lane-dense (1, TN) output row ----
    logits = jnp.dot(wo_ref[...], pooled.T,
                     preferred_element_type=jnp.float32) + bo_ref[...]  # (1, TN)
    out_ref[...] = logits.reshape(out_ref.shape).astype(out_ref.dtype)


def init_params(key, in_channels):
    ks = jax.random.split(key, 20)
    p = {}
    # conv1: (128, Cin, 8)
    p["w1"] = jax.random.normal(ks[0], (C1, in_channels, K1), jnp.float32) * 0.1
    p["b1"] = jax.random.normal(ks[1], (C1,), jnp.float32) * 0.1
    p["g1"] = jax.random.uniform(ks[2], (C1,), jnp.float32, 0.5, 1.5)
    p["beta1"] = jax.random.normal(ks[3], (C1,), jnp.float32) * 0.1
    p["m1"] = jax.random.normal(ks[4], (C1,), jnp.float32) * 0.1
    p["v1"] = jax.random.uniform(ks[5], (C1,), jnp.float32, 0.5, 1.5)
    # conv2: (256, 128, 5)
    p["w2"] = jax.random.normal(ks[6], (C2, C1, K2), jnp.float32) * 0.05
    p["b2"] = jax.random.normal(ks[7], (C2,), jnp.float32) * 0.1
    p["g2"] = jax.random.uniform(ks[8], (C2,), jnp.float32, 0.5, 1.5)
    p["beta2"] = jax.random.normal(ks[9], (C2,), jnp.float32) * 0.1
    p["m2"] = jax.random.normal(ks[10], (C2,), jnp.float32) * 0.1
    p["v2"] = jax.random.uniform(ks[11], (C2,), jnp.float32, 0.5, 1.5)
    # conv3: (128, 256, 3)
    p["w3"] = jax.random.normal(ks[12], (C3, C2, K3), jnp.float32) * 0.05
    p["b3"] = jax.random.normal(ks[13], (C3,), jnp.float32) * 0.1
    p["g3"] = jax.random.uniform(ks[14], (C3,), jnp.float32, 0.5, 1.5)
    p["beta3"] = jax.random.normal(ks[15], (C3,), jnp.float32) * 0.1
    p["m3"] = jax.random.normal(ks[16], (C3,), jnp.float32) * 0.1
    p["v3"] = jax.random.uniform(ks[17], (C3,), jnp.float32, 0.5, 1.5)
    # output linear: (1, 128)
    p["wo"] = jax.random.normal(ks[18], (1, C3), jnp.float32) * 0.1
    p["bo"] = jax.random.normal(ks[19], (1,), jnp.float32) * 0.1
    return p


def _fold_bn(conv_w, conv_b, gamma, beta, mean, var):
    """Fold inference-mode BN into conv. conv_w: (Cout, Cin, K) -> (K, Cin, Cout)."""
    scale = gamma / jnp.sqrt(var + BN_EPS)                 # (Cout,)
    w_klc = jnp.transpose(conv_w, (2, 1, 0))               # (K, Cin, Cout)
    w_eff = w_klc * scale[None, None, :]
    b_eff = (conv_b - mean) * scale + beta                 # (Cout,)
    return w_eff, b_eff.reshape(1, -1)


def _round_up(x, m):
    return ((x + m - 1) // m) * m


def _tpu_generation():
    try:
        kind = (jax.devices()[0].device_kind or "").lower()
    except Exception:
        kind = ""
    for g in ("v7", "v6", "v5"):
        if g in kind:
            return g
    return "unknown"


def _pick_tile_n(n, k1c, l1c, l2c, l3c, itemsize, budget_bytes, tile_cap):
    """Batch-tile size: per-tile working set <= budget_bytes (rough f32/bf16 estimate)."""
    per_row = (2 * l1c * k1c * itemsize              # x tile (double-buffered)
               + l1c * C1 * (4 + itemsize)           # h1 f32 + compute-dtype copy
               + l2c * K2 * C1 * itemsize            # p2 concat (worst case)
               + l2c * C2 * (4 + itemsize)           # h2 f32 + compute-dtype copy
               + l3c * C2 * itemsize                 # layer-3 tap
               + 2 * l3c * C3 * 4)                   # layer-3 accumulator / h3
    t = max(8, min(tile_cap, (budget_bytes // max(per_row, 1)) // 8 * 8))
    return min(t, _round_up(n, 8))


@functools.partial(jax.jit, static_argnames=("in_channels", "winsize", "compute_dtype"))
def fcn_forward(x, params, *, in_channels, winsize, compute_dtype=jnp.bfloat16):
    if winsize < (K1 - 1) + (K2 - 1) + (K3 - 1) + 1:       # need >= 1 pos after conv3
        raise ValueError(f"winsize={winsize} too small for kernel sizes 8/5/3")

    # PyTorch forward: x.reshape(-1, in_channels, winsize)  (NCL)
    x = x.reshape(-1, in_channels, winsize)
    n = x.shape[0]
    l1 = winsize - (K1 - 1)
    l2 = l1 - (K2 - 1)
    l3 = l2 - (K3 - 1)
    k1c = K1 * in_channels
    itemsize = jnp.dtype(compute_dtype).itemsize

    # Pad each layer's length to the sublane pack so the in-kernel (n,l,c)<->(n*l,c)
    # reshapes are layout-free; the pool reads only the true l3 positions.
    lp = 16 if itemsize < 4 else 8
    l3c = _round_up(l3, lp)
    l2c = _round_up(max(l2, l3c + K3 - 1), lp)
    l1c = _round_up(max(l1, l2c + K2 - 1), lp)

    # Generation-aware tiling / VMEM budget.
    gen = _tpu_generation()
    if gen in ("v5", "v6"):      # 128 MiB VMEM parts
        budget, tile_cap, vmem_limit = 20 << 20, 512, 64 << 20
    else:                        # v7x (64 MiB VMEM) and unknown: conservative
        budget, tile_cap, vmem_limit = 8 << 20, 128, 32 << 20
    per_tap_l2 = (gen == "v5")   # 128x128 MXU: 640-wide concat buys nothing on v5e

    tile_n = _pick_tile_n(n, k1c, l1c, l2c, l3c, itemsize, budget, tile_cap)
    n_pad8 = _round_up(n, 8)
    if gen == "v7" and n_pad8 >= 16:
        # Keep >= 2 grid steps so the ("parallel",) batch axis can use both TensorCores.
        tile_n = min(tile_n, max(8, (n_pad8 // 2) // 8 * 8))
    num_tiles = -(-n // tile_n)
    n_pad = num_tiles * tile_n

    # NCL -> NLC (channels on lanes), then layer-1 im2col in the wrapper (Cin is tiny,
    # so the duplicated x stream is negligible; contraction grows Cin -> K1*Cin).
    x_nlc = jnp.transpose(x, (0, 2, 1)).astype(jnp.float32)           # (N, W, Cin)
    x_i2c = jnp.concatenate([x_nlc[:, k:k + l1, :] for k in range(K1)],
                            axis=-1).astype(compute_dtype)            # (N, L1, K1*Cin)
    x_i2c = jnp.pad(x_i2c, ((0, n_pad - n), (0, l1c - l1), (0, 0)))

    # Fold inference-mode BN into conv weights/biases, im2col matmul layout.
    w1, b1 = _fold_bn(params["w1"], params["b1"], params["g1"], params["beta1"],
                      params["m1"], params["v1"])
    w2, b2 = _fold_bn(params["w2"], params["b2"], params["g2"], params["beta2"],
                      params["m2"], params["v2"])
    w3, b3 = _fold_bn(params["w3"], params["b3"], params["g3"], params["beta3"],
                      params["m3"], params["v3"])
    w1 = w1.reshape(k1c, C1).astype(compute_dtype)
    w2 = w2.reshape(K2 * C1, C2).astype(compute_dtype)
    w3 = w3.reshape(K3 * C2, C3).astype(compute_dtype)
    wo = params["wo"].reshape(1, C3).astype(jnp.float32)
    bo = params["bo"].reshape(1, 1).astype(jnp.float32)

    const2 = lambda i: (0, 0)
    in_specs = [
        pl.BlockSpec((tile_n, l1c, k1c), lambda i: (i, 0, 0)),  # x tile (pipelined)
        pl.BlockSpec((k1c, C1), const2),                        # weights: VMEM-resident
        pl.BlockSpec((1, C1), const2),
        pl.BlockSpec((K2 * C1, C2), const2),
        pl.BlockSpec((1, C2), const2),
        pl.BlockSpec((K3 * C2, C3), const2),
        pl.BlockSpec((1, C3), const2),
        pl.BlockSpec((1, C3), const2),
        pl.BlockSpec((1, 1), const2),
    ]
    out_specs = pl.BlockSpec((1, 1, tile_n), lambda i: (i, 0, 0))   # lane-dense row

    flops = 2 * n_pad * (l1c * k1c * C1 + l2c * (K2 * C1) * C2
                         + l3c * (K3 * C2) * C3 + C3)
    bytes_accessed = (n_pad * l1c * k1c * itemsize
                      + (k1c * C1 + K2 * C1 * C2 + K3 * C2 * C3) * itemsize
                      + (C1 + C2 + 2 * C3 + 1) * 4
                      + n_pad * 4)

    out = pl.pallas_call(
        functools.partial(fcn_kernel, l2c=l2c, l3c=l3c, l3_true=l3,
                          per_tap_l2=per_tap_l2, compute_dtype=compute_dtype),
        out_shape=jax.ShapeDtypeStruct((num_tiles, 1, tile_n), jnp.float32),
        grid=(num_tiles,),
        in_specs=in_specs,
        out_specs=out_specs,
        compiler_params=pltpu.CompilerParams(
            dimension_semantics=("parallel",),
            vmem_limit_bytes=vmem_limit),
        cost_estimate=pl.CostEstimate(flops=flops, transcendentals=0,
                                      bytes_accessed=bytes_accessed),
    )(x_i2c, w1, b1, w2, b2, w3, b3, wo, bo)
    return out.reshape(-1)[:n].reshape(n, 1)


def fcn_reference(x, params, *, in_channels, winsize):
    """Pure-JAX reference of the PyTorch forward (inference-mode BN)."""
    x = x.reshape(-1, in_channels, winsize).astype(jnp.float32)

    def conv1d(h, w, b):
        y = lax.conv_general_dilated(h, w, window_strides=(1,), padding="VALID",
                                     dimension_numbers=("NCH", "OIH", "NCH"))
        return y + b[None, :, None]

    def bn(h, g, beta, m, v):
        return g[None, :, None] * (h - m[None, :, None]) / \
            jnp.sqrt(v[None, :, None] + BN_EPS) + beta[None, :, None]

    h = jnp.maximum(bn(conv1d(x, params["w1"], params["b1"]),
                       params["g1"], params["beta1"], params["m1"], params["v1"]), 0.0)
    h = jnp.maximum(bn(conv1d(h, params["w2"], params["b2"]),
                       params["g2"], params["beta2"], params["m2"], params["v2"]), 0.0)
    h = jnp.maximum(bn(conv1d(h, params["w3"], params["b3"]),
                       params["g3"], params["beta3"], params["m3"], params["v3"]), 0.0)
    pooled = jnp.mean(h, axis=2)                           # (N, 128)
    return pooled @ params["wo"].T + params["bo"][None, :]


if __name__ == "__main__":
    in_channels = 4
    winsize = 16
    batch = 2

    key = jax.random.PRNGKey(0)
    kx, kp = jax.random.split(key)
    x = jax.random.normal(kx, (batch, in_channels, winsize), jnp.float32)
    params = init_params(kp, in_channels)

    ref = fcn_reference(x, params, in_channels=in_channels, winsize=winsize)

    # f32 path: tight correctness check.
    out_f32 = jax.block_until_ready(
        fcn_forward(x, params, in_channels=in_channels, winsize=winsize,
                    compute_dtype=jnp.float32))
    assert out_f32.shape == (batch, 1), out_f32.shape
    assert jnp.allclose(out_f32, ref, atol=1e-3, rtol=1e-3), (out_f32, ref)

    # default bf16 path: looser tolerance (bf16 operands, f32 accumulation).
    out_bf16 = jax.block_until_ready(
        fcn_forward(x, params, in_channels=in_channels, winsize=winsize))
    assert out_bf16.shape == (batch, 1), out_bf16.shape
    assert jnp.allclose(out_bf16, ref, atol=1e-1, rtol=1e-1), (out_bf16, ref)

    print("KERNEL_OK")
</pallas_src>

<mosaic_0001>
module attributes {stable_mosaic.version = 11 : i64} {
  func.func @fcn_kernel(%arg0: i32, %arg1: memref<8x24x32xf32, #tpu.memory_space<vmem>>, %arg2: memref<32x128xf32, #tpu.memory_space<vmem>>, %arg3: memref<1x128xf32, #tpu.memory_space<vmem>>, %arg4: memref<640x256xf32, #tpu.memory_space<vmem>>, %arg5: memref<1x256xf32, #tpu.memory_space<vmem>>, %arg6: memref<768x128xf32, #tpu.memory_space<vmem>>, %arg7: memref<1x128xf32, #tpu.memory_space<vmem>>, %arg8: memref<1x128xf32, #tpu.memory_space<vmem>>, %arg9: memref<1x1xf32, #tpu.memory_space<vmem>>, %arg10: memref<1x1x8xf32, #tpu.memory_space<vmem>>) attributes {dimension_semantics = [#tpu.dimension_semantics<parallel>], iteration_bounds = array<i64: 1>, scalar_prefetch = 0 : i64, scratch_operands = 0 : i64, tpu.core_type = #tpu.core_type<tc>, window_params = [{transform_indices = @transform_0, window_bounds = array<i64: 8, 24, 32>}, {pipeline_mode = #tpu.pipeline_mode<synchronous>, transform_indices = @transform_1, window_bounds = array<i64: 32, 128>}, {pipeline_mode = #tpu.pipeline_mode<synchronous>, transform_indices = @transform_2, window_bounds = array<i64: 1, 128>}, {pipeline_mode = #tpu.pipeline_mode<synchronous>, transform_indices = @transform_3, window_bounds = array<i64: 640, 256>}, {pipeline_mode = #tpu.pipeline_mode<synchronous>, transform_indices = @transform_4, window_bounds = array<i64: 1, 256>}, {pipeline_mode = #tpu.pipeline_mode<synchronous>, transform_indices = @transform_5, window_bounds = array<i64: 768, 128>}, {pipeline_mode = #tpu.pipeline_mode<synchronous>, transform_indices = @transform_6, window_bounds = array<i64: 1, 128>}, {pipeline_mode = #tpu.pipeline_mode<synchronous>, transform_indices = @transform_7, window_bounds = array<i64: 1, 128>}, {pipeline_mode = #tpu.pipeline_mode<synchronous>, transform_indices = @transform_8, window_bounds = array<i64: 1, 1>}, {transform_indices = @transform_9, window_bounds = array<i64: 1, 1, 8>}]} {
    %c0 = arith.constant 0 : index
    %c0_0 = arith.constant 0 : index
    %c0_1 = arith.constant 0 : index
    %0 = vector.load %arg1[%c0, %c0_0, %c0_1] : memref<8x24x32xf32, #tpu.memory_space<vmem>>, vector<8x24x32xf32>
    %1 = vector.shape_cast %0 : vector<8x24x32xf32> to vector<192x32xf32>
    %c0_2 = arith.constant 0 : index
    %c0_3 = arith.constant 0 : index
    %2 = vector.load %arg2[%c0_2, %c0_3] : memref<32x128xf32, #tpu.memory_space<vmem>>, vector<32x128xf32>
    %cst = arith.constant dense<0.000000e+00> : vector<192x128xf32>
    %3 = tpu.matmul %1, %2, %cst {dimension_numbers = #tpu.dot_dimension_numbers<[1], [0], [0], [1], [0, 0, 1, 1], [], []>} : vector<192x32xf32>, vector<32x128xf32>, vector<192x128xf32> -> vector<192x128xf32>
    %c0_4 = arith.constant 0 : index
    %c0_5 = arith.constant 0 : index
    %4 = vector.load %arg3[%c0_4, %c0_5] : memref<1x128xf32, #tpu.memory_space<vmem>>, vector<1x128xf32>
    %5 = vector.broadcast %4 : vector<1x128xf32> to vector<192x128xf32>
    %6 = arith.addf %3, %5 : vector<192x128xf32>
    %cst_6 = arith.constant 0.000000e+00 : f32
    %7 = vector.broadcast %cst_6 : f32 to vector<192x128xf32>
    %8 = arith.maximumf %6, %7 : vector<192x128xf32>
    %9 = vector.shape_cast %8 : vector<192x128xf32> to vector<8x24x128xf32>
    %10 = vector.extract_strided_slice %9 {offsets = [0, 0, 0], sizes = [8, 16, 128], strides = [1, 1, 1]} : vector<8x24x128xf32> to vector<8x16x128xf32>
    %11 = vector.extract_strided_slice %9 {offsets = [0, 1, 0], sizes = [8, 16, 128], strides = [1, 1, 1]} : vector<8x24x128xf32> to vector<8x16x128xf32>
    %12 = vector.extract_strided_slice %9 {offsets = [0, 2, 0], sizes = [8, 16, 128], strides = [1, 1, 1]} : vector<8x24x128xf32> to vector<8x16x128xf32>
    %13 = vector.extract_strided_slice %9 {offsets = [0, 3, 0], sizes = [8, 16, 128], strides = [1, 1, 1]} : vector<8x24x128xf32> to vector<8x16x128xf32>
    %14 = vector.extract_strided_slice %9 {offsets = [0, 4, 0], sizes = [8, 16, 128], strides = [1, 1, 1]} : vector<8x24x128xf32> to vector<8x16x128xf32>
    %15 = tpu.concatenate %10, %11, %12, %13, %14 in 2 : vector<8x16x128xf32>, vector<8x16x128xf32>, vector<8x16x128xf32>, vector<8x16x128xf32>, vector<8x16x128xf32> -> vector<8x16x640xf32>
    %16 = vector.shape_cast %15 : vector<8x16x640xf32> to vector<128x640xf32>
    %c0_7 = arith.constant 0 : index
    %c0_8 = arith.constant 0 : index
    %17 = vector.load %arg4[%c0_7, %c0_8] : memref<640x256xf32, #tpu.memory_space<vmem>>, vector<640x256xf32>
    %cst_9 = arith.constant dense<0.000000e+00> : vector<128x256xf32>
    %18 = tpu.matmul %16, %17, %cst_9 {dimension_numbers = #tpu.dot_dimension_numbers<[1], [0], [0], [1], [0, 0, 1, 1], [], []>} : vector<128x640xf32>, vector<640x256xf32>, vector<128x256xf32> -> vector<128x256xf32>
    %c0_10 = arith.constant 0 : index
    %c0_11 = arith.constant 0 : index
    %19 = vector.load %arg5[%c0_10, %c0_11] : memref<1x256xf32, #tpu.memory_space<vmem>>, vector<1x256xf32>
    %20 = vector.broadcast %19 : vector<1x256xf32> to vector<128x256xf32>
    %21 = arith.addf %18, %20 : vector<128x256xf32>
    %cst_12 = arith.constant 0.000000e+00 : f32
    %22 = vector.broadcast %cst_12 : f32 to vector<128x256xf32>
    %23 = arith.maximumf %21, %22 : vector<128x256xf32>
    %24 = vector.shape_cast %23 : vector<128x256xf32> to vector<8x16x256xf32>
    %25 = vector.extract_strided_slice %24 {offsets = [0, 0, 0], sizes = [8, 8, 256], strides = [1, 1, 1]} : vector<8x16x256xf32> to vector<8x8x256xf32>
    %26 = vector.shape_cast %25 : vector<8x8x256xf32> to vector<64x256xf32>
    %c0_13 = arith.constant 0 : index
    %c0_14 = arith.constant 0 : index
    %27 = vector.load %arg6[%c0_13, %c0_14] : memref<768x128xf32, #tpu.memory_space<vmem>>, vector<256x128xf32>
    %cst_15 = arith.constant dense<0.000000e+00> : vector<64x128xf32>
    %28 = tpu.matmul %26, %27, %cst_15 {dimension_numbers = #tpu.dot_dimension_numbers<[1], [0], [0], [1], [0, 0, 1, 1], [], []>} : vector<64x256xf32>, vector<256x128xf32>, vector<64x128xf32> -> vector<64x128xf32>
    %29 = vector.extract_strided_slice %24 {offsets = [0, 1, 0], sizes = [8, 8, 256], strides = [1, 1, 1]} : vector<8x16x256xf32> to vector<8x8x256xf32>
    %30 = vector.shape_cast %29 : vector<8x8x256xf32> to vector<64x256xf32>
    %c256 = arith.constant 256 : index
    %c0_16 = arith.constant 0 : index
    %31 = vector.load %arg6[%c256, %c0_16] : memref<768x128xf32, #tpu.memory_space<vmem>>, vector<256x128xf32>
    %cst_17 = arith.constant dense<0.000000e+00> : vector<64x128xf32>
    %32 = tpu.matmul %30, %31, %cst_17 {dimension_numbers = #tpu.dot_dimension_numbers<[1], [0], [0], [1], [0, 0, 1, 1], [], []>} : vector<64x256xf32>, vector<256x128xf32>, vector<64x128xf32> -> vector<64x128xf32>
    %33 = arith.addf %28, %32 : vector<64x128xf32>
    %34 = vector.extract_strided_slice %24 {offsets = [0, 2, 0], sizes = [8, 8, 256], strides = [1, 1, 1]} : vector<8x16x256xf32> to vector<8x8x256xf32>
    %35 = vector.shape_cast %34 : vector<8x8x256xf32> to vector<64x256xf32>
    %c512 = arith.constant 512 : index
    %c0_18 = arith.constant 0 : index
    %36 = vector.load %arg6[%c512, %c0_18] : memref<768x128xf32, #tpu.memory_space<vmem>>, vector<256x128xf32>
    %cst_19 = arith.constant dense<0.000000e+00> : vector<64x128xf32>
    %37 = tpu.matmul %35, %36, %cst_19 {dimension_numbers = #tpu.dot_dimension_numbers<[1], [0], [0], [1], [0, 0, 1, 1], [], []>} : vector<64x256xf32>, vector<256x128xf32>, vector<64x128xf32> -> vector<64x128xf32>
    %38 = arith.addf %33, %37 : vector<64x128xf32>
    %c0_20 = arith.constant 0 : index
    %c0_21 = arith.constant 0 : index
    %39 = vector.load %arg7[%c0_20, %c0_21] : memref<1x128xf32, #tpu.memory_space<vmem>>, vector<1x128xf32>
    %40 = vector.broadcast %39 : vector<1x128xf32> to vector<64x128xf32>
    %41 = arith.addf %38, %40 : vector<64x128xf32>
    %cst_22 = arith.constant 0.000000e+00 : f32
    %42 = vector.broadcast %cst_22 : f32 to vector<64x128xf32>
    %43 = arith.maximumf %41, %42 : vector<64x128xf32>
    %44 = vector.shape_cast %43 : vector<64x128xf32> to vector<8x8x128xf32>
    %45 = vector.extract_strided_slice %44 {offsets = [0, 0, 0], sizes = [8, 3, 128], strides = [1, 1, 1]} : vector<8x8x128xf32> to vector<8x3x128xf32>
    %cst_23 = arith.constant dense<0.000000e+00> : vector<8x128xf32>
    %46 = vector.multi_reduction <add>, %45, %cst_23 [1] : vector<8x3x128xf32> to vector<8x128xf32>
    %cst_24 = arith.constant 0.333333343 : f32
    %47 = vector.broadcast %cst_24 : f32 to vector<8x128xf32>
    %48 = arith.mulf %46, %47 : vector<8x128xf32>
    %c0_25 = arith.constant 0 : index
    %c0_26 = arith.constant 0 : index
    %49 = vector.load %arg8[%c0_25, %c0_26] : memref<1x128xf32, #tpu.memory_space<vmem>>, vector<1x128xf32>
    %50 = tpu.transpose %48, [1, 0] : vector<8x128xf32> -> vector<128x8xf32>
    %cst_27 = arith.constant dense<0.000000e+00> : vector<1x8xf32>
    %51 = tpu.matmul %49, %50, %cst_27 {dimension_numbers = #tpu.dot_dimension_numbers<[1], [0], [0], [1], [0, 0, 1, 1], [], []>} : vector<1x128xf32>, vector<128x8xf32>, vector<1x8xf32> -> vector<1x8xf32>
    %c0_28 = arith.constant 0 : index
    %c0_29 = arith.constant 0 : index
    %52 = vector.load %arg9[%c0_28, %c0_29] : memref<1x1xf32, #tpu.memory_space<vmem>>, vector<1x1xf32>
    %53 = vector.broadcast %52 : vector<1x1xf32> to vector<1x8xf32>
    %54 = arith.addf %51, %53 : vector<1x8xf32>
    %55 = vector.shape_cast %54 : vector<1x8xf32> to vector<1x1x8xf32>
    %c0_30 = arith.constant 0 : index
    %c0_31 = arith.constant 0 : index
    %c0_32 = arith.constant 0 : index
    %56 = vector.load %arg10[%c0_30, %c0_31, %c0_32] : memref<1x1x8xf32, #tpu.memory_space<vmem>>, vector<1x1x8xf32>
    tpu.vector_store %arg10[%c0_30, %c0_31, %c0_32], %55 {strides = array<i32>} : memref<1x1x8xf32, #tpu.memory_space<vmem>>, vector<1x1x8xf32>,
    return
  }
  func.func @transform_0(%arg0: i32) -> (i32, i32, i32) {
    %c0_i32 = arith.constant 0 : i32
    %c0_i32_0 = arith.constant 0 : i32
    %c0_i32_1 = arith.constant 0 : i32
    return %arg0, %c0_i32, %c0_i32_0 : i32, i32, i32
  }
  func.func @transform_1(%arg0: i32) -> (i32, i32) {
    %c0_i32 = arith.constant 0 : i32
    %c0_i32_0 = arith.constant 0 : i32
    %c0_i32_1 = arith.constant 0 : i32
    return %c0_i32, %c0_i32_0 : i32, i32
  }
  func.func @transform_2(%arg0: i32) -> (i32, i32) {
    %c0_i32 = arith.constant 0 : i32
    %c0_i32_0 = arith.constant 0 : i32
    %c0_i32_1 = arith.constant 0 : i32
    return %c0_i32, %c0_i32_0 : i32, i32
  }
  func.func @transform_3(%arg0: i32) -> (i32, i32) {
    %c0_i32 = arith.constant 0 : i32
    %c0_i32_0 = arith.constant 0 : i32
    %c0_i32_1 = arith.constant 0 : i32
    return %c0_i32, %c0_i32_0 : i32, i32
  }
  func.func @transform_4(%arg0: i32) -> (i32, i32) {
    %c0_i32 = arith.constant 0 : i32
    %c0_i32_0 = arith.constant 0 : i32
    %c0_i32_1 = arith.constant 0 : i32
    return %c0_i32, %c0_i32_0 : i32, i32
  }
  func.func @transform_5(%arg0: i32) -> (i32, i32) {
    %c0_i32 = arith.constant 0 : i32
    %c0_i32_0 = arith.constant 0 : i32
    %c0_i32_1 = arith.constant 0 : i32
    return %c0_i32, %c0_i32_0 : i32, i32
  }
  func.func @transform_6(%arg0: i32) -> (i32, i32) {
    %c0_i32 = arith.constant 0 : i32
    %c0_i32_0 = arith.constant 0 : i32
    %c0_i32_1 = arith.constant 0 : i32
    return %c0_i32, %c0_i32_0 : i32, i32
  }
  func.func @transform_7(%arg0: i32) -> (i32, i32) {
    %c0_i32 = arith.constant 0 : i32
    %c0_i32_0 = arith.constant 0 : i32
    %c0_i32_1 = arith.constant 0 : i32
    return %c0_i32, %c0_i32_0 : i32, i32
  }
  func.func @transform_8(%arg0: i32) -> (i32, i32) {
    %c0_i32 = arith.constant 0 : i32
    %c0_i32_0 = arith.constant 0 : i32
    %c0_i32_1 = arith.constant 0 : i32
    return %c0_i32, %c0_i32_0 : i32, i32
  }
  func.func @transform_9(%arg0: i32) -> (i32, i32, i32) {
    %c0_i32 = arith.constant 0 : i32
    %c0_i32_0 = arith.constant 0 : i32
    %c0_i32_1 = arith.constant 0 : i32
    return %arg0, %c0_i32, %c0_i32_0 : i32, i32, i32
  }
}

</mosaic_0001>

<bundles_post_ra>
// kernel: fcn_forward.1
= control target key start
LH: loop header
LB: loop body
LE: loop exit
PB: predicated region body
PF: predicated region fallthrough
CT: control target
= control target key end

     0   :  { %vm69_vm0 = vcmask 261120   ;;  %vm375_vm1 = vcmask 1046528   ;;  %vm489_vm2 = vcmask 1044480   ;;  %vm432_vm3 = vcmask 1045504   ;;  %s4124_s1 = inlined_call_operand.vmem [shape: f32[32,128], index: 1, kind: input, shape index: {}]   ;;  %s4125_s0 = inlined_call_operand.vmem [shape: f32[8,24,32], index: 0, kind: input, shape index: {}]   ;;  %s4126_s3 = inlined_call_operand.vmem [shape: f32[640,256], index: 3, kind: input, shape index: {}]   ;;  %s4127_s2 = inlined_call_operand.vmem [shape: f32[1,128], index: 2, kind: input, shape index: {}]   ;;  %s4128_s5 = inlined_call_operand.vmem [shape: f32[768,128], index: 5, kind: input, shape index: {}]   ;;  %s4129_s4 = inlined_call_operand.vmem [shape: f32[1,256], index: 4, kind: input, shape index: {}]   ;;  %s4130_s8 = inlined_call_operand.<no memory space> [shape: f32[1,1], index: 8, kind: input, shape index: {}]   ;;  %s4131_s6 = inlined_call_operand.vmem [shape: f32[1,128], index: 6, kind: input, shape index: {}]   ;;  %s4132_s7 = inlined_call_operand.vmem [shape: f32[1,128], index: 7, kind: input, shape index: {}]   ;;  %s4133_s9 = inlined_call_operand.vmem [shape: f32[1,1,8], index: 9, kind: output, shape index: {}]  }
   0x1   :  { %v61_v0 = vld [vmem:[%s4124_s1 + $0x18] sm:$0xff]  ;;  %v60_v1 = vld [vmem:[%s4124_s1 + $0x10] sm:$0xff]  ;;  %v34_v2 = vld [vmem:[%s4125_s0] sm:$0xff]  ;;  %vm546_vm4 = vcmask 1043456   ;;  %vm2377_vm5 = vmmov 0   ;;  %vm1892_vm6 = vcmask 1042432  }
   0x2   :  { %2291 = vmatprep.subr.mxu0 %v61_v0  ;;  %v59_v3 = vld [vmem:[%s4124_s1 + $0x8] sm:$0xff]  ;;  %2299 = vmatprep.mubr.msk.f32.mxu0 %vm69_vm0, %v34_v2  ;;  %v58_v4 = vld [vmem:[%s4124_s1] sm:$0xff]  ;;  %v36_v6 = vld [vmem:[%s4125_s0 + $0x10] sm:$0xff]  ;;  %vm1976_vm7 = vcmask 1041409   ;;  %vm1978_vm8 = vcmask 1042434   ;;  %vm1980_vm9 = vcmask 1043459  }
   0x3   :  { %2292 = vmatpush3.msra.mxu0 %v61_v0  ;;  %v35_v5 = vld [vmem:[%s4125_s0 + $0x8] sm:$0xff]  ;;  %v37_v7 = vld [vmem:[%s4125_s0 + $0x18] sm:$0xff]  ;;  %v633_v10 = vld [vmem:[%s4126_s3 + $0xf0] sm:$0xff]  ;;  %vm1982_vm10 = vcmask 1044484   ;;  %vm1984_vm11 = vcmask 1045509   ;;  %vm1986_vm12 = vcmask 1046534  }
   0x4   :  { %2293 = vmatprep.subr.mxu0 %v60_v1  ;;  %v634_v8 = vld [vmem:[%s4126_s3 + $0xf8] sm:$0xff]  ;;  %v697_v11 = vld [vmem:[%s4126_s3 + $0x2f0] sm:$0xff]  ;;  %v632_v12 = vld [vmem:[%s4126_s3 + $0xe8] sm:$0xff]  ;;  %vm1988_vm13 = vcmask 1047559   ;;  %vm2061_vm14 = vcmask 57344  }
   0x5   :  { %2294 = vmatpush3.msra.mxu0 %v60_v1  ;;  %v698_v9 = vld [vmem:[%s4126_s3 + $0x2f8] sm:$0xff]  ;;  %775 = vmatprep.subr.mxu1 %v634_v8  ;;  %v38_v13 = vld [vmem:[%s4125_s0 + $0x20] sm:$0xff]  ;;  %v696_v14 = vld [vmem:[%s4126_s3 + $0x2e8] sm:$0xff] }
   0x6   :  { %2295 = vmatprep.subr.mxu0 %v59_v3  ;;  %776 = vmatpush1.msra.mxu1 %v633_v10  ;;  %v631_v15 = vld [vmem:[%s4126_s3 + $0xe0] sm:$0xff]  ;;  %v630_v17 = vld [vmem:[%s4126_s3 + $0xd8] sm:$0xff]  ;;  %v629_v19 = vld [vmem:[%s4126_s3 + $0xd0] sm:$0xff] }
   0x7   :  { %2296 = vmatpush3.msra.mxu0 %v59_v3  ;;  %777 = vmatprep.subr.mxu1 %v632_v12  ;;  %v695_v16 = vld [vmem:[%s4126_s3 + $0x2e0] sm:$0xff]  ;;  %v694_v18 = vld [vmem:[%s4126_s3 + $0x2d8] sm:$0xff]  ;;  %v39_v20 = vld [vmem:[%s4125_s0 + $0x28] sm:$0xff] }
   0x8   :  { %2297 = vmatprep.subr.mxu0 %v58_v4  ;;  %778 = vmatpush1.msra.mxu1 %v631_v15  ;;  %v628_v21 = vld [vmem:[%s4126_s3 + $0xc8] sm:$0xff]  ;;  %v40_v22 = vld [vmem:[%s4125_s0 + $0x30] sm:$0xff]  ;;  %v627_v25 = vld [vmem:[%s4126_s3 + $0xc0] sm:$0xff] }
   0x9   :  { %2298 = vmatpush3.msra.mxu0 %v58_v4  ;;  %779 = vmatprep.subr.mxu1 %v630_v17  ;;  %v693_v23 = vld [vmem:[%s4126_s3 + $0x2d0] sm:$0xff]  ;;  %v692_v24 = vld [vmem:[%s4126_s3 + $0x2c8] sm:$0xff]  ;;  %v691_v26 = vld [vmem:[%s4126_s3 + $0x2c0] sm:$0xff] }
   0xa   :  { %2300 = vmatmul.mubr.msk.f32.vlgmr.msra.gmra.mxu0 %vm69_vm0, %v35_v5  ;;  %936 = vmatprep.subr.mxu0 %v698_v9  ;;  %v626_v27 = vld [vmem:[%s4126_s3 + $0xb8] sm:$0xff]  ;;  %v42_v30 = vld [vmem:[%s4125_s0 + $0x40] sm:$0xff]  ;;  %v625_v31 = vld [vmem:[%s4126_s3 + $0xb0] sm:$0xff] }
   0xb   :  { %2302 = vmatprep.mubr.msk.f32.mxu0 %vm69_vm0, %v36_v6  ;;  %937 = vmatpush1.msra.mxu0 %v697_v11  ;;  %v41_v28 = vld [vmem:[%s4125_s0 + $0x38] sm:$0xff]  ;;  %v689_v32 = vld [vmem:[%s4126_s3 + $0x2b0] sm:$0xff]  ;;  %v624_v33 = vld [vmem:[%s4126_s3 + $0xa8] sm:$0xff] }
   0xc   :  { %938 = vmatprep.subr.mxu0 %v696_v14  ;;  %780 = vmatpush1.msra.mxu1 %v629_v19  ;;  %v690_v29 = vld [vmem:[%s4126_s3 + $0x2b8] sm:$0xff]  ;;  %v688_v34 = vld [vmem:[%s4126_s3 + $0x2a8] sm:$0xff]  ;;  %v623_v35 = vld [vmem:[%s4126_s3 + $0xa0] sm:$0xff] }
   0xd   :  { %939 = vmatpush1.msra.mxu0 %v695_v16  ;;  %781 = vmatprep.subr.mxu1 %v628_v21  ;;  %v43_v36 = vld [vmem:[%s4125_s0 + $0x48] sm:$0xff]  ;;  %v622_v37 = vld [vmem:[%s4126_s3 + $0x98] sm:$0xff]  ;;  %v44_v38 = vld [vmem:[%s4125_s0 + $0x50] sm:$0xff] }
   0xe   :  { %2303 = vmatmul.mubr.msk.f32.gmra.mxu0 %vm69_vm0, %v37_v7  ;;  %940 = vmatprep.subr.mxu0 %v694_v18  ;;  %v687_v39 = vld [vmem:[%s4126_s3 + $0x2a0] sm:$0xff]  ;;  %v686_v40 = vld [vmem:[%s4126_s3 + $0x298] sm:$0xff]  ;;  %v621_v41 = vld [vmem:[%s4126_s3 + $0x90] sm:$0xff] }
   0xf   :  { %2305 = vmatprep.mubr.msk.f32.mxu0 %vm69_vm0, %v38_v13  ;;  %941 = vmatpush1.msra.mxu0 %v693_v23  ;;  %v685_v42 = vld [vmem:[%s4126_s3 + $0x290] sm:$0xff]  ;;  %v620_v43 = vld [vmem:[%s4126_s3 + $0x88] sm:$0xff]  ;;  %v45_v44 = vld [vmem:[%s4125_s0 + $0x58] sm:$0xff] }
  0x10   :  { %942 = vmatprep.subr.mxu0 %v692_v24  ;;  %782 = vmatpush1.msra.mxu1 %v627_v25  ;;  %v684_v45 = vld [vmem:[%s4126_s3 + $0x288] sm:$0xff]  ;;  %v46_v46 = vld [vmem:[%s4125_s0 + $0x60] sm:$0xff]  ;;  %v618_v49 = vld [vmem:[%s4126_s3 + $0x78] sm:$0xff] }
  0x11   :  { %943 = vmatpush1.msra.mxu0 %v691_v26  ;;  %783 = vmatprep.subr.mxu1 %v626_v27  ;;  %v619_v47 = vld [vmem:[%s4126_s3 + $0x80] sm:$0xff]  ;;  %v682_v50 = vld [vmem:[%s4126_s3 + $0x278] sm:$0xff]  ;;  %v617_v51 = vld [vmem:[%s4126_s3 + $0x70] sm:$0xff] }
  0x12   :  { %2306 = vmatmul.mubr.msk.f32.gmra.mxu0 %vm69_vm0, %v39_v20  ;;  %944 = vmatprep.subr.mxu0 %v690_v29  ;;  %v683_v48 = vld [vmem:[%s4126_s3 + $0x280] sm:$0xff]  ;;  %v47_v52 = vld [vmem:[%s4125_s0 + $0x68] sm:$0xff]  ;;  %v48_v54 = vld [vmem:[%s4125_s0 + $0x70] sm:$0xff] }
  0x13   :  { %2308 = vmatprep.mubr.msk.f32.mxu0 %vm69_vm0, %v40_v22  ;;  %784 = vmatpush1.msra.mxu1 %v625_v31  ;;  %v616_v53 = vld [vmem:[%s4126_s3 + $0x68] sm:$0xff]  ;;  %v681_v55 = vld [vmem:[%s4126_s3 + $0x270] sm:$0xff]  ;;  %v615_v57 = vld [vmem:[%s4126_s3 + $0x60] sm:$0xff] }
  0x14   :  { %945 = vmatpush1.msra.mxu0 %v689_v32  ;;  %785 = vmatprep.subr.mxu1 %v624_v33  ;;  %v680_v56 = vld [vmem:[%s4126_s3 + $0x268] sm:$0xff]  ;;  %v679_v58 = vld [vmem:[%s4126_s3 + $0x260] sm:$0xff]  ;;  %v614_v59 = vld [vmem:[%s4126_s3 + $0x58] sm:$0xff] }
  0x15   :  { %946 = vmatprep.subr.mxu0 %v688_v34  ;;  %786 = vmatpush1.msra.mxu1 %v623_v35  ;;  %v49_v60 = vld [vmem:[%s4125_s0 + $0x78] sm:$0xff]  ;;  %v50_v62 = vld [vmem:[%s4125_s0 + $0x80] sm:$0xff]  ;;  %v613_v63 = vld [vmem:[%s4126_s3 + $0x50] sm:$0xff] }
  0x16   :  { %2309 = vmatmul.mubr.msk.f32.gmra.mxu0 %vm69_vm0, %v41_v28  ;;  %787 = vmatprep.subr.mxu1 %v622_v37  ;;  %v678_v61 = vld [vmem:[%s4126_s3 + $0x258] sm:$0xff]  ;;  %v677_v0 = vld [vmem:[%s4126_s3 + $0x250] sm:$0xff]  ;;  %v612_v1 = vld [vmem:[%s4126_s3 + $0x48] sm:$0xff] }
  0x17   :  { %2311 = vmatprep.mubr.msk.f32.mxu0 %vm69_vm0, %v42_v30  ;;  %947 = vmatpush1.msra.mxu0 %v687_v39  ;;  %v676_v2 = vld [vmem:[%s4126_s3 + $0x248] sm:$0xff]  ;;  %v611_v3 = vld [vmem:[%s4126_s3 + $0x40] sm:$0xff]  ;;  %v610_v5 = vld [vmem:[%s4126_s3 + $0x38] sm:$0xff] }
  0x18   :  { %948 = vmatprep.subr.mxu0 %v686_v40  ;;  %788 = vmatpush1.msra.mxu1 %v621_v41  ;;  %v51_v4 = vld [vmem:[%s4125_s0 + $0x88] sm:$0xff]  ;;  %v52_v6 = vld [vmem:[%s4125_s0 + $0x90] sm:$0xff]  ;;  %v675_v7 = vld [vmem:[%s4126_s3 + $0x240] sm:$0xff] }
  0x19   :  { %949 = vmatpush1.msra.mxu0 %v685_v42  ;;  %789 = vmatprep.subr.mxu1 %v620_v43  ;;  %v674_v8 = vld [vmem:[%s4126_s3 + $0x238] sm:$0xff]  ;;  %v609_v9 = vld [vmem:[%s4126_s3 + $0x30] sm:$0xff]  ;;  %v608_v11 = vld [vmem:[%s4126_s3 + $0x28] sm:$0xff] }
  0x1a   :  { %2312 = vmatmul.mubr.msk.f32.gmra.mxu0 %vm69_vm0, %v43_v36  ;;  %950 = vmatprep.subr.mxu0 %v684_v45  ;;  %v673_v10 = vld [vmem:[%s4126_s3 + $0x230] sm:$0xff]  ;;  %v53_v12 = vld [vmem:[%s4125_s0 + $0x98] sm:$0xff]  ;;  %v672_v13 = vld [vmem:[%s4126_s3 + $0x228] sm:$0xff] }
  0x1b   :  { %2314 = vmatprep.mubr.msk.f32.mxu0 %vm69_vm0, %v44_v38  ;;  %790 = vmatpush1.msra.mxu1 %v619_v47  ;;  %v54_v14 = vld [vmem:[%s4125_s0 + $0xa0] sm:$0xff]  ;;  %v606_v17 = vld [vmem:[%s4126_s3 + $0x18] sm:$0xff]  ;;  %v605_v19 = vld [vmem:[%s4126_s3 + $0x10] sm:$0xff] }
  0x1c   :  { %951 = vmatpush1.msra.mxu0 %v683_v48  ;;  %791 = vmatprep.subr.mxu1 %v618_v49  ;;  %v607_v15 = vld [vmem:[%s4126_s3 + $0x20] sm:$0xff]  ;;  %v670_v18 = vld [vmem:[%s4126_s3 + $0x218] sm:$0xff]  ;;  %v55_v20 = vld [vmem:[%s4125_s0 + $0xa8] sm:$0xff] }
  0x1d   :  { %952 = vmatprep.subr.mxu0 %v682_v50  ;;  %792 = vmatpush1.msra.mxu1 %v617_v51  ;;  %v671_v16 = vld [vmem:[%s4126_s3 + $0x220] sm:$0xff]  ;;  %v604_v21 = vld [vmem:[%s4126_s3 + $0x8] sm:$0xff]  ;;  %v56_v22 = vld [vmem:[%s4125_s0 + $0xb0] sm:$0xff] }
  0x1e   :  { %2315 = vmatmul.mubr.msk.f32.gmra.mxu0 %vm69_vm0, %v45_v44  ;;  %793 = vmatprep.subr.mxu1 %v616_v53  ;;  %v669_v23 = vld [vmem:[%s4126_s3 + $0x210] sm:$0xff]  ;;  %v668_v24 = vld [vmem:[%s4126_s3 + $0x208] sm:$0xff]  ;;  %v603_v25 = vld [vmem:[%s4126_s3] sm:$0xff] }
  0x1f   :  { %2317 = vmatprep.mubr.msk.f32.mxu0 %vm69_vm0, %v46_v46  ;;  %953 = vmatpush1.msra.mxu0 %v681_v55  ;;  %v667_v26 = vld [vmem:[%s4126_s3 + $0x200] sm:$0xff]  ;;  %v666_v27 = vld [vmem:[%s4126_s3 + $0x1f8] sm:$0xff]  ;;  %v665_v30 = vld [vmem:[%s4126_s3 + $0x1f0] sm:$0xff] }
  0x20   :  { %954 = vmatprep.subr.mxu0 %v680_v56  ;;  %794 = vmatpush1.msra.mxu1 %v615_v57  ;;  %v57_v28 = vld [vmem:[%s4125_s0 + $0xb8] sm:$0xff]  ;;  %v729_v31 = vld [vmem:[%s4126_s3 + $0x3f0] sm:$0xff]  ;;  %v664_v32 = vld [vmem:[%s4126_s3 + $0x1e8] sm:$0xff] }
  0x21   :  { %955 = vmatpush1.msra.mxu0 %v679_v58  ;;  %795 = vmatprep.subr.mxu1 %v614_v59  ;;  %v730_v29 = vld [vmem:[%s4126_s3 + $0x3f8] sm:$0xff]  ;;  %v728_v33 = vld [vmem:[%s4126_s3 + $0x3e8] sm:$0xff]  ;;  %v663_v34 = vld [vmem:[%s4126_s3 + $0x1e0] sm:$0xff] }
  0x22   :  { %2318 = vmatmul.mubr.msk.f32.gmra.mxu0 %vm69_vm0, %v47_v52  ;;  %956 = vmatprep.subr.mxu0 %v678_v61  ;;  %v727_v35 = vld [vmem:[%s4126_s3 + $0x3e0] sm:$0xff]  ;;  %v662_v36 = vld [vmem:[%s4126_s3 + $0x1d8] sm:$0xff]  ;;  %v661_v38 = vld [vmem:[%s4126_s3 + $0x1d0] sm:$0xff] }
  0x23   :  { %2320 = vmatprep.mubr.msk.f32.mxu0 %vm69_vm0, %v48_v54  ;;  %796 = vmatpush1.msra.mxu1 %v613_v63  ;;  %v726_v37 = vld [vmem:[%s4126_s3 + $0x3d8] sm:$0xff]  ;;  %v725_v39 = vld [vmem:[%s4126_s3 + $0x3d0] sm:$0xff]  ;;  %v660_v40 = vld [vmem:[%s4126_s3 + $0x1c8] sm:$0xff] }
  0x24   :  { %957 = vmatpush1.msra.mxu0 %v677_v0  ;;  %797 = vmatprep.subr.mxu1 %v612_v1  ;;  %v724_v41 = vld [vmem:[%s4126_s3 + $0x3c8] sm:$0xff]  ;;  %v659_v42 = vld [vmem:[%s4126_s3 + $0x1c0] sm:$0xff]  ;;  %v658_v44 = vld [vmem:[%s4126_s3 + $0x1b8] sm:$0xff] }
  0x25   :  { %958 = vmatprep.subr.mxu0 %v676_v2  ;;  %798 = vmatpush1.msra.mxu1 %v611_v3  ;;  %v723_v43 = vld [vmem:[%s4126_s3 + $0x3c0] sm:$0xff]  ;;  %v722_v45 = vld [vmem:[%s4126_s3 + $0x3b8] sm:$0xff]  ;;  %v657_v46 = vld [vmem:[%s4126_s3 + $0x1b0] sm:$0xff] }
  0x26   :  { %2321 = vmatmul.mubr.msk.f32.gmra.mxu0 %vm69_vm0, %v49_v60  ;;  %799 = vmatprep.subr.mxu1 %v610_v5  ;;  %v721_v47 = vld [vmem:[%s4126_s3 + $0x3b0] sm:$0xff]  ;;  %v656_v48 = vld [vmem:[%s4126_s3 + $0x1a8] sm:$0xff]  ;;  %v655_v50 = vld [vmem:[%s4126_s3 + $0x1a0] sm:$0xff] }
  0x27   :  { %2323 = vmatprep.mubr.msk.f32.mxu0 %vm69_vm0, %v50_v62  ;;  %959 = vmatpush1.msra.mxu0 %v675_v7  ;;  %v720_v49 = vld [vmem:[%s4126_s3 + $0x3a8] sm:$0xff]  ;;  %v719_v51 = vld [vmem:[%s4126_s3 + $0x3a0] sm:$0xff]  ;;  %v654_v52 = vld [vmem:[%s4126_s3 + $0x198] sm:$0xff] }
  0x28   :  { %960 = vmatprep.subr.mxu0 %v674_v8  ;;  %800 = vmatpush1.msra.mxu1 %v609_v9  ;;  %v718_v53 = vld [vmem:[%s4126_s3 + $0x398] sm:$0xff]  ;;  %v653_v54 = vld [vmem:[%s4126_s3 + $0x190] sm:$0xff]  ;;  %v652_v56 = vld [vmem:[%s4126_s3 + $0x188] sm:$0xff] }
  0x29   :  { %961 = vmatpush1.msra.mxu0 %v673_v10  ;;  %801 = vmatprep.subr.mxu1 %v608_v11  ;;  %v717_v55 = vld [vmem:[%s4126_s3 + $0x390] sm:$0xff]  ;;  %v716_v57 = vld [vmem:[%s4126_s3 + $0x388] sm:$0xff]  ;;  %v651_v58 = vld [vmem:[%s4126_s3 + $0x180] sm:$0xff] }
  0x2a   :  { %2324 = vmatmul.mubr.msk.f32.gmra.mxu0 %vm69_vm0, %v51_v4  ;;  %962 = vmatprep.subr.mxu0 %v672_v13  ;;  %v715_v59 = vld [vmem:[%s4126_s3 + $0x380] sm:$0xff]  ;;  %v650_v60 = vld [vmem:[%s4126_s3 + $0x178] sm:$0xff]  ;;  %v649_v62 = vld [vmem:[%s4126_s3 + $0x170] sm:$0xff] }
  0x2b   :  { %2326 = vmatprep.mubr.msk.f32.mxu0 %vm69_vm0, %v52_v6  ;;  %802 = vmatpush1.msra.mxu1 %v607_v15  ;;  %v714_v61 = vld [vmem:[%s4126_s3 + $0x378] sm:$0xff]  ;;  %v713_v63 = vld [vmem:[%s4126_s3 + $0x370] sm:$0xff]  ;;  %v648_v0 = vld [vmem:[%s4126_s3 + $0x168] sm:$0xff] }
  0x2c   :  { %963 = vmatpush1.msra.mxu0 %v671_v16  ;;  %803 = vmatprep.subr.mxu1 %v606_v17  ;;  %v712_v1 = vld [vmem:[%s4126_s3 + $0x368] sm:$0xff]  ;;  %v647_v2 = vld [vmem:[%s4126_s3 + $0x160] sm:$0xff]  ;;  %v646_v4 = vld [vmem:[%s4126_s3 + $0x158] sm:$0xff] }
  0x2d   :  { %964 = vmatprep.subr.mxu0 %v670_v18  ;;  %804 = vmatpush1.msra.mxu1 %v605_v19  ;;  %v711_v3 = vld [vmem:[%s4126_s3 + $0x360] sm:$0xff]  ;;  %v710_v5 = vld [vmem:[%s4126_s3 + $0x358] sm:$0xff]  ;;  %v645_v6 = vld [vmem:[%s4126_s3 + $0x150] sm:$0xff] }
  0x2e   :  { %2327 = vmatmul.mubr.msk.f32.gmra.mxu0 %vm69_vm0, %v53_v12  ;;  %805 = vmatprep.subr.mxu1 %v604_v21  ;;  %v709_v7 = vld [vmem:[%s4126_s3 + $0x350] sm:$0xff]  ;;  %v644_v8 = vld [vmem:[%s4126_s3 + $0x148] sm:$0xff]  ;;  %v643_v10 = vld [vmem:[%s4126_s3 + $0x140] sm:$0xff] }
  0x2f   :  { %2329 = vmatprep.mubr.msk.f32.mxu0 %vm69_vm0, %v54_v14  ;;  %965 = vmatpush1.msra.mxu0 %v669_v23  ;;  %v708_v9 = vld [vmem:[%s4126_s3 + $0x348] sm:$0xff]  ;;  %v707_v11 = vld [vmem:[%s4126_s3 + $0x340] sm:$0xff]  ;;  %v642_v12 = vld [vmem:[%s4126_s3 + $0x138] sm:$0xff] }
  0x30   :  { %966 = vmatprep.subr.mxu0 %v668_v24  ;;  %806 = vmatpush1.msra.mxu1 %v603_v25  ;;  %v706_v13 = vld [vmem:[%s4126_s3 + $0x338] sm:$0xff]  ;;  %v641_v14 = vld [vmem:[%s4126_s3 + $0x130] sm:$0xff]  ;;  %v640_v16 = vld [vmem:[%s4126_s3 + $0x128] sm:$0xff] }
  0x31   :  { %967 = vmatpush1.msra.mxu0 %v667_v26  ;;  %807 = vmatprep.subr.mxu1 %v666_v27  ;;  %v705_v15 = vld [vmem:[%s4126_s3 + $0x330] sm:$0xff]  ;;  %v704_v17 = vld [vmem:[%s4126_s3 + $0x328] sm:$0xff]  ;;  %v639_v18 = vld [vmem:[%s4126_s3 + $0x120] sm:$0xff] }
  0x32   :  { %2330 = vmatmul.mubr.msk.f32.gmra.mxu0 %vm69_vm0, %v55_v20  ;;  %968 = vmatprep.subr.mxu0 %v730_v29  ;;  %v703_v19 = vld [vmem:[%s4126_s3 + $0x320] sm:$0xff]  ;;  %v638_v20 = vld [vmem:[%s4126_s3 + $0x118] sm:$0xff]  ;;  %v701_v23 = vld [vmem:[%s4126_s3 + $0x310] sm:$0xff] }
  0x33   :  { %2332 = vmatprep.mubr.msk.f32.mxu0 %vm69_vm0, %v56_v22  ;;  %808 = vmatpush2.msra.mxu1 %v665_v30  ;;  %v702_v21 = vld [vmem:[%s4126_s3 + $0x318] sm:$0xff]  ;;  %v637_v22 = vld [vmem:[%s4126_s3 + $0x110] sm:$0xff]  ;;  %v636_v24 = vld [vmem:[%s4126_s3 + $0x108] sm:$0xff] }
  0x34   :  { %969 = vmatpush2.msra.mxu0 %v729_v31  ;;  %809 = vmatprep.subr.mxu1 %v664_v32  ;;  %v700_v25 = vld [vmem:[%s4126_s3 + $0x308] sm:$0xff]  ;;  %v635_v26 = vld [vmem:[%s4126_s3 + $0x100] sm:$0xff] }
  0x35   :  { %970 = vmatprep.subr.mxu0 %v728_v33  ;;  %810 = vmatpush2.msra.mxu1 %v663_v34  ;;  %v699_v27 = vld [vmem:[%s4126_s3 + $0x300] sm:$0xff] }
  0x36   :  { %2333 = vmatmul.mubr.msk.f32.gmra.mxu0 %vm69_vm0, %v57_v28  ;;  %811 = vmatprep.subr.mxu1 %v662_v36  ;;  %v762_v28 = vld [vmem:[%s4126_s3 + $0x4f8] sm:$0xff]  ;;  %v2927_v29 = vld [vmem:[%s4127_s2] ss:$0 sm:$0xff] }
  0x37   :  { %971 = vmatpush2.msra.mxu0 %v727_v35  ;;  %812 = vmatpush2.msra.mxu1 %v661_v38 }
  0x38   :  { %972 = vmatprep.subr.mxu0 %v726_v37  ;;  %813 = vmatprep.subr.mxu1 %v660_v40 }
  0x39   :  { %973 = vmatpush2.msra.mxu0 %v725_v39  ;;  %814 = vmatpush2.msra.mxu1 %v659_v42 }
  0x3a   :  { %974 = vmatprep.subr.mxu0 %v724_v41  ;;  %815 = vmatprep.subr.mxu1 %v658_v44 }
  0x3b   :  { %975 = vmatpush2.msra.mxu0 %v723_v43  ;;  %816 = vmatpush2.msra.mxu1 %v657_v46 }
  0x3c   :  { %976 = vmatprep.subr.mxu0 %v722_v45  ;;  %817 = vmatprep.subr.mxu1 %v656_v48 }
  0x3d   :  { %977 = vmatpush2.msra.mxu0 %v721_v47  ;;  %818 = vmatpush2.msra.mxu1 %v655_v50 }
  0x3e   :  { %978 = vmatprep.subr.mxu0 %v720_v49  ;;  %819 = vmatprep.subr.mxu1 %v654_v52  ;;  %v761_v52 = vld [vmem:[%s4126_s3 + $0x4f0] sm:$0xff] }
  0x3f   :  { %979 = vmatpush2.msra.mxu0 %v719_v51  ;;  %820 = vmatpush2.msra.mxu1 %v653_v54 }
  0x40   :  { %980 = vmatprep.subr.mxu0 %v718_v53  ;;  %821 = vmatprep.subr.mxu1 %v652_v56  ;;  %v760_v56 = vld [vmem:[%s4126_s3 + $0x4e8] sm:$0xff] }
  0x41   :  { %981 = vmatpush2.msra.mxu0 %v717_v55  ;;  %822 = vmatpush2.msra.mxu1 %v651_v58 }
  0x42   :  { %982 = vmatprep.subr.mxu0 %v716_v57  ;;  %823 = vmatprep.subr.mxu1 %v650_v60 }
  0x43   :  { %983 = vmatpush2.msra.mxu0 %v715_v59  ;;  %824 = vmatpush2.msra.mxu1 %v649_v62 }
  0x44   :  { %984 = vmatprep.subr.mxu0 %v714_v61  ;;  %825 = vmatprep.subr.mxu1 %v648_v0 }
  0x45   :  { %985 = vmatpush2.msra.mxu0 %v713_v63  ;;  %826 = vmatpush2.msra.mxu1 %v647_v2 }
  0x46   :  { %986 = vmatprep.subr.mxu0 %v712_v1  ;;  %827 = vmatprep.subr.mxu1 %v646_v4 }
  0x47   :  { %987 = vmatpush2.msra.mxu0 %v711_v3  ;;  %828 = vmatpush2.msra.mxu1 %v645_v6  ;;  %v759_v6 = vld [vmem:[%s4126_s3 + $0x4e0] sm:$0xff] }
  0x48   :  { %988 = vmatprep.subr.mxu0 %v710_v5  ;;  %829 = vmatprep.subr.mxu1 %v644_v8 }
  0x49   :  { %989 = vmatpush2.msra.mxu0 %v709_v7  ;;  %830 = vmatpush2.msra.mxu1 %v643_v10 }
  0x4a   :  { %990 = vmatprep.subr.mxu0 %v708_v9  ;;  %831 = vmatprep.subr.mxu1 %v642_v12 }
  0x4b   :  { %991 = vmatpush2.msra.mxu0 %v707_v11  ;;  %832 = vmatpush2.msra.mxu1 %v641_v14  ;;  %v758_v11 = vld [vmem:[%s4126_s3 + $0x4d8] sm:$0xff] }
  0x4c   :  { %992 = vmatprep.subr.mxu0 %v706_v13  ;;  %833 = vmatprep.subr.mxu1 %v640_v16 }
  0x4d   :  { %993 = vmatpush2.msra.mxu0 %v705_v15  ;;  %834 = vmatpush2.msra.mxu1 %v639_v18 }
  0x4e   :  { %994 = vmatprep.subr.mxu0 %v704_v17  ;;  %835 = vmatprep.subr.mxu1 %v638_v20 }
  0x4f   :  { %995 = vmatpush2.msra.mxu0 %v703_v19  ;;  %836 = vmatpush2.msra.mxu1 %v637_v22 }
  0x50   :  { %996 = vmatprep.subr.mxu0 %v702_v21  ;;  %837 = vmatprep.subr.mxu1 %v636_v24 }
  0x51   :  { %997 = vmatpush2.msra.mxu0 %v701_v23  ;;  %838 = vmatpush2.msra.mxu1 %v635_v26 }
  0x52   :  { %998 = vmatprep.subr.mxu0 %v700_v25  ;;  %1097 = vmatprep.subr.mxu1 %v762_v28 }
  0x53   :  { %999 = vmatpush2.msra.mxu0 %v699_v27 }
  0xca   :  { %v2301_v30 = vpop.f32.mrf.mxu0 }
  0xcb   :  { %v214_v31 = vadd.f32 %v2301_v30, %v2927_v29  ;;  %v757_v30 = vld [vmem:[%s4126_s3 + $0x4d0] sm:$0xff] }
  0xcc   :  { %v208_v32 = vpop.f32.mrf.mxu0 }
  0xcd   :  { %v2930_v33 = vmax.f32 %v214_v31, 0.0  ;;  %v209_v34 = vadd.f32 %v2927_v29, %v208_v32 }
  0xce   :  { %v2304_v35 = vpop.f32.mrf.mxu0 }
  0xcf   :  { %v327_v36 = vmax.f32 %v209_v34, 0.0  ;;  %v224_v37 = vadd.f32 %v2304_v35, %v2927_v29  ;;  %v377_v39 = vrot.slane %v2930_v33, 1  ;;  %v491_v43 = vrot.slane %v2930_v33, 3 }
  0xd0   :  { %v218_v38 = vpop.f32.mrf.mxu0  ;;  %v434_v46 = vrot.slane %v2930_v33, 2  ;;  %v548_v57 = vrot.slane %v2930_v33, 4 }
  0xd1   :  { %v219_v40 = vadd.f32 %v2927_v29, %v218_v38  ;;  %v376_v41 = vrot.slane %v327_v36, 1  ;;  %v490_v42 = vrot.slane %v327_v36, 3  ;;  %v433_v45 = vrot.slane %v327_v36, 2 }
  0xd2   :  { %v2307_v44 = vpop.f32.mrf.mxu0  ;;  %v547_v47 = vrot.slane %v327_v36, 4  ;;  %v2944_v53 = vmax.f32 %v224_v37, 0.0 }
  0xd3   :  { %v329_v48 = vmax.f32 %v219_v40, 0.0  ;;  %v234_v49 = vadd.f32 %v2307_v44, %v2927_v29  ;;  %v378_v50 = vsel %vm375_vm1, %v376_v41, %v377_v39  ;;  %v492_v51 = vsel %vm489_vm2, %v490_v42, %v491_v43 }
  0xd4   :  { %v228_v54 = vpop.f32.mrf.mxu0  ;;  %839 = vmatprep.mubr.f32.mxu1 %v378_v50  ;;  %1000 = vmatprep.mubr.f32.mxu0 %v492_v51  ;;  %v435_v55 = vsel %vm432_vm3, %v433_v45, %v434_v46  ;;  %v2955_v0 = vsel %vm546_vm4, %v547_v47, %v548_v57  ;;  %v381_v9 = vrot.slane %v2944_v53, 1  ;;  %v495_v10 = vrot.slane %v2944_v53, 3  ;;  %v755_v51 = vld [vmem:[%s4126_s3 + $0x4c0] sm:$0xff] }
  0xd5   :  { %v229_v58 = vadd.f32 %v2927_v29, %v228_v54  ;;  %840 = vmatmul.mubr.f32.vlgmr.msra.gmra.mxu1 %v327_v36  ;;  %1001 = vmatmul.mubr.f32.vlgmr.msra.gmra.mxu0 %v435_v55  ;;  %v379_v59 = vrot.slane %v329_v48, 1  ;;  %v493_v60 = vrot.slane %v329_v48, 3  ;;  %v2952_v61 = vmax.f32 %v234_v49, 0.0  ;;  %v756_v36 = vld [vmem:[%s4126_s3 + $0x4c8] sm:$0xff]  ;;  %v754_v55 = vld [vmem:[%s4126_s3 + $0x4b8] sm:$0xff] }
  0xd6   :  { %v2310_v62 = vpop.f32.mrf.mxu0  ;;  %v436_v63 = vrot.slane %v329_v48, 2  ;;  %1098 = vmatpush1.msra.mxu1 %v761_v52  ;;  %v550_v1 = vrot.slane %v329_v48, 4  ;;  %v438_v17 = vrot.slane %v2944_v53, 2  ;;  %v552_v31 = vrot.slane %v2944_v53, 4 }
  0xd7   :  { %v2957_v2 = vmax.f32 %v229_v58, 0.0  ;;  %v244_v3 = vadd.f32 %v2310_v62, %v2927_v29  ;;  %v380_v4 = vsel %vm375_vm1, %v377_v39, %v379_v59  ;;  %v494_v5 = vsel %vm489_vm2, %v491_v43, %v493_v60  ;;  %1099 = vmatprep.subr.mxu1 %v760_v56 }
  0xd8   :  { %v238_v7 = vpop.f32.mrf.mxu0  ;;  %845 = vmatprep.mubr.f32.mxu1 %v380_v4  ;;  %1006 = vmatprep.mubr.f32.mxu0 %v494_v5  ;;  %v437_v8 = vsel %vm432_vm3, %v434_v46, %v436_v63  ;;  %v384_v19 = vrot.slane %v2952_v61, 1  ;;  %v2981_v20 = vsel %vm546_vm4, %v548_v57, %v550_v1  ;;  %v498_v24 = vrot.slane %v2952_v61, 3  ;;  %v753_v4 = vld [vmem:[%s4126_s3 + $0x4b0] sm:$0xff] }
  0xd9   :  { %v2971_v12 = vmax.f32 %v244_v3, 0.0  ;;  %v239_v13 = vadd.f32 %v2927_v29, %v238_v7  ;;  %846 = vmatmul.mubr.f32.gmra.mxu1 %v2930_v33  ;;  %1007 = vmatmul.mubr.f32.gmra.mxu0 %v437_v8  ;;  %v382_v14 = vrot.slane %v2957_v2, 1  ;;  %v496_v15 = vrot.slane %v2957_v2, 3 }
  0xda   :  { %v2313_v16 = vpop.f32.mrf.mxu0  ;;  %v439_v18 = vrot.slane %v2957_v2, 2  ;;  %1100 = vmatpush1.msra.mxu1 %v759_v6  ;;  %v441_v27 = vrot.slane %v2952_v61, 2  ;;  %v553_v40 = vrot.slane %v2957_v2, 4  ;;  %v555_v41 = vrot.slane %v2952_v61, 4 }
  0xdb   :  { %v2983_v21 = vmax.f32 %v239_v13, 0.0  ;;  %v383_v22 = vsel %vm375_vm1, %v381_v9, %v382_v14  ;;  %v497_v23 = vsel %vm489_vm2, %v495_v10, %v496_v15  ;;  %1101 = vmatprep.subr.mxu1 %v758_v11  ;;  %v387_v28 = vrot.slane %v2971_v12, 1  ;;  %v752_v9 = vld [vmem:[%s4126_s3 + $0x4a8] sm:$0xff] }
  0xdc   :  { %v248_v25 = vpop.f32.mrf.mxu0  ;;  %851 = vmatprep.mubr.f32.mxu1 %v383_v22  ;;  %1012 = vmatprep.mubr.f32.mxu0 %v497_v23  ;;  %v440_v26 = vsel %vm432_vm3, %v438_v17, %v439_v18  ;;  %v385_v33 = vsel %vm375_vm1, %v382_v14, %v384_v19  ;;  %v499_v34 = vsel %vm489_vm2, %v496_v15, %v498_v24  ;;  %v501_v39 = vrot.slane %v2971_v12, 3  ;;  %v751_v23 = vld [vmem:[%s4126_s3 + $0x4a0] sm:$0xff] }
  0xdd   :  { %v249_v32 = vadd.f32 %v2927_v29, %v248_v25  ;;  %852 = vmatmul.mubr.f32.gmra.mxu1 %v2944_v53  ;;  %1013 = vmatmul.mubr.f32.gmra.mxu0 %v440_v26  ;;  %v386_v35 = vrot.slane %v2983_v21, 1  ;;  %v500_v38 = vrot.slane %v2983_v21, 3  ;;  %v254_v42 = vadd.f32 %v2313_v16, %v2927_v29 }
  0xde   :  { %v2316_v37 = vpop.f32.mrf.mxu0  ;;  %857 = vmatprep.mubr.f32.mxu1 %v385_v33  ;;  %1018 = vmatprep.mubr.f32.mxu0 %v499_v34  ;;  %v442_v44 = vsel %vm432_vm3, %v439_v18, %v441_v27  ;;  %v443_v49 = vrot.slane %v2983_v21, 2  ;;  %v444_v50 = vrot.slane %v2971_v12, 2  ;;  %v3027_v57 = vsel %vm546_vm4, %v552_v31, %v553_v40 }
  0xdf   :  { %v3008_v43 = vmax.f32 %v249_v32, 0.0  ;;  %v388_v45 = vsel %vm375_vm1, %v386_v35, %v387_v28  ;;  %1102 = vmatpush1.msra.mxu1 %v757_v30  ;;  %v264_v46 = vadd.f32 %v2316_v37, %v2927_v29  ;;  %v502_v48 = vsel %vm489_vm2, %v500_v38, %v501_v39 }
  0xe0   :  { %v258_v47 = vpop.f32.mrf.mxu0  ;;  %1103 = vmatprep.subr.mxu1 %v756_v36  ;;  %v3030_v58 = vsel %vm546_vm4, %v553_v40, %v555_v41  ;;  %v3032_v59 = vmax.f32 %v254_v42, 0.0  ;;  %v445_v63 = vsel %vm432_vm3, %v443_v49, %v444_v50  ;;  %v557_v32 = vrot.slane %v2983_v21, 4 }
  0xe1   :  { %v259_v52 = vadd.f32 %v2927_v29, %v258_v47  ;;  %858 = vmatmul.mubr.f32.gmra.mxu1 %v2957_v2  ;;  %1019 = vmatmul.mubr.f32.gmra.mxu0 %v442_v44  ;;  %v389_v53 = vrot.slane %v3008_v43, 1  ;;  %v503_v54 = vrot.slane %v3008_v43, 3  ;;  %v3037_v62 = vmax.f32 %v264_v46, 0.0  ;;  %v748_v46 = vld [vmem:[%s4126_s3 + $0x488] sm:$0xff] }
  0xe2   :  { %863 = vmatprep.mubr.f32.mxu1 %v388_v45  ;;  %1024 = vmatprep.mubr.f32.mxu0 %v502_v48  ;;  %v2319_v56 = vpop.f32.mrf.mxu0  ;;  %v446_v3 = vrot.slane %v3008_v43, 2  ;;  %v391_v14 = vrot.slane %v3032_v59, 1  ;;  %v505_v15 = vrot.slane %v3032_v59, 3  ;;  %v448_v18 = vrot.slane %v3032_v59, 2 }
  0xe3   :  { %v3034_v60 = vmax.f32 %v259_v52, 0.0  ;;  %v274_v61 = vadd.f32 %v2319_v56, %v2927_v29  ;;  %1104 = vmatpush1.msra.mxu1 %v755_v51  ;;  %v390_v2 = vsel %vm375_vm1, %v387_v28, %v389_v53  ;;  %v504_v6 = vsel %vm489_vm2, %v501_v39, %v503_v54  ;;  %v750_v28 = vld [vmem:[%s4126_s3 + $0x498] sm:$0xff] }
  0xe4   :  { %v268_v1 = vpop.f32.mrf.mxu0  ;;  %1105 = vmatprep.subr.mxu1 %v754_v55  ;;  %v447_v16 = vsel %vm432_vm3, %v444_v50, %v446_v3  ;;  %v394_v22 = vrot.slane %v3037_v62, 1  ;;  %v508_v27 = vrot.slane %v3037_v62, 3  ;;  %v558_v33 = vrot.slane %v2971_v12, 4 }
  0xe5   :  { %864 = vmatmul.mubr.f32.gmra.mxu1 %v2983_v21  ;;  %1025 = vmatmul.mubr.f32.gmra.mxu0 %v445_v63  ;;  %v269_v5 = vadd.f32 %v2927_v29, %v268_v1  ;;  %v392_v7 = vrot.slane %v3034_v60, 1  ;;  %v506_v8 = vrot.slane %v3034_v60, 3  ;;  %v3053_v11 = vmax.f32 %v274_v61, 0.0  ;;  %v747_v1 = vld [vmem:[%s4126_s3 + $0x480] sm:$0xff] }
  0xe6   :  { %869 = vmatprep.mubr.f32.mxu1 %v390_v2  ;;  %1030 = vmatprep.mubr.f32.mxu0 %v504_v6  ;;  %v2322_v10 = vpop.f32.mrf.mxu0  ;;  %v449_v19 = vrot.slane %v3034_v60, 2  ;;  %v560_v34 = vrot.slane %v3008_v43, 4  ;;  %v451_v21 = vrot.slane %v3037_v62, 2  ;;  %v3100_v49 = vsel %vm546_vm4, %v557_v32, %v558_v33  ;;  %v746_v6 = vld [vmem:[%s4126_s3 + $0x478] sm:$0xff] }
  0xe7   :  { %v3055_v13 = vmax.f32 %v269_v5, 0.0  ;;  %1106 = vmatpush1.msra.mxu1 %v753_v4  ;;  %v393_v25 = vsel %vm375_vm1, %v391_v14, %v392_v7  ;;  %v507_v26 = vsel %vm489_vm2, %v505_v15, %v506_v8  ;;  %v284_v30 = vadd.f32 %v2322_v10, %v2927_v29 }
  0xe8   :  { %v278_v17 = vpop.f32.mrf.mxu0  ;;  %1107 = vmatprep.subr.mxu1 %v752_v9  ;;  %v397_v36 = vrot.slane %v3053_v11, 1  ;;  %v511_v38 = vrot.slane %v3053_v11, 3  ;;  %v450_v39 = vsel %vm432_vm3, %v448_v18, %v449_v19  ;;  %v395_v41 = vsel %vm375_vm1, %v392_v7, %v394_v22  ;;  %v745_v22 = vld [vmem:[%s4126_s3 + $0x470] sm:$0xff] }
  0xe9   :  { %870 = vmatmul.mubr.f32.gmra.mxu1 %v2971_v12  ;;  %1031 = vmatmul.mubr.f32.gmra.mxu0 %v447_v16  ;;  %v279_v24 = vadd.f32 %v2927_v29, %v278_v17  ;;  %v396_v35 = vrot.slane %v3055_v13, 1  ;;  %v510_v37 = vrot.slane %v3055_v13, 3  ;;  %v749_v12 = vld [vmem:[%s4126_s3 + $0x490] sm:$0xff]  ;;  %v509_v45 = vsel %vm489_vm2, %v506_v8, %v508_v27  ;;  %v744_v27 = vld [vmem:[%s4126_s3 + $0x468] sm:$0xff] }
  0xea   :  { %875 = vmatprep.mubr.f32.mxu1 %v393_v25  ;;  %1036 = vmatprep.mubr.f32.mxu0 %v507_v26  ;;  %v2325_v31 = vpop.f32.mrf.mxu0  ;;  %v3097_v47 = vmax.f32 %v284_v30, 0.0  ;;  %v3103_v50 = vsel %vm546_vm4, %v558_v33, %v560_v34  ;;  %v563_v51 = vrot.slane %v3034_v60, 4  ;;  %v453_v54 = vrot.slane %v3055_v13, 2 }
  0xeb   :  { %1108 = vmatpush1.msra.mxu1 %v751_v23  ;;  %v3088_v42 = vmax.f32 %v279_v24, 0.0  ;;  %v294_v43 = vadd.f32 %v2325_v31, %v2927_v29  ;;  %v398_v52 = vsel %vm375_vm1, %v396_v35, %v397_v36  ;;  %v512_v53 = vsel %vm489_vm2, %v510_v37, %v511_v38 }
  0xec   :  { %v288_v40 = vpop.f32.mrf.mxu0  ;;  %1109 = vmatprep.subr.mxu1 %v750_v28  ;;  %v454_v55 = vrot.slane %v3053_v11, 2  ;;  %v452_v61 = vsel %vm432_vm3, %v449_v19, %v451_v21  ;;  %v562_v2 = vrot.slane %v3032_v59, 4  ;;  %v401_v15 = vrot.slane %v3097_v47, 1 }
  0xed   :  { %876 = vmatmul.mubr.f32.gmra.mxu1 %v3032_v59  ;;  %1037 = vmatmul.mubr.f32.gmra.mxu0 %v450_v39  ;;  %v289_v44 = vadd.f32 %v2927_v29, %v288_v40  ;;  %v3117_v3 = vmax.f32 %v294_v43, 0.0  ;;  %v399_v4 = vrot.slane %v3088_v42, 1  ;;  %v513_v5 = vrot.slane %v3088_v42, 3 }
  0xee   :  { %881 = vmatprep.mubr.f32.mxu1 %v395_v41  ;;  %1042 = vmatprep.mubr.f32.mxu0 %v509_v45  ;;  %v2328_v48 = vpop.f32.mrf.mxu0  ;;  %v456_v8 = vrot.slane %v3088_v42, 2  ;;  %v3129_v59 = vsel %vm546_vm4, %v562_v2, %v563_v51  ;;  %v455_v10 = vsel %vm432_vm3, %v453_v54, %v454_v55  ;;  %v515_v18 = vrot.slane %v3097_v47, 3 }
  0xef   :  { %1110 = vmatpush1.msra.mxu1 %v749_v12  ;;  %v3110_v56 = vmax.f32 %v289_v44, 0.0  ;;  %v304_v9 = vadd.f32 %v2328_v48, %v2927_v29  ;;  %v458_v23 = vrot.slane %v3097_v47, 2  ;;  %v400_v24 = vsel %vm375_vm1, %v397_v36, %v399_v4  ;;  %v742_v44 = vld [vmem:[%s4126_s3 + $0x458] sm:$0xff]  ;;  %v740_v4 = vld [vmem:[%s4126_s3 + $0x448] sm:$0xff] }
  0xf0   :  { %1111 = vmatprep.subr.mxu1 %v748_v46  ;;  %v298_v63 = vpop.f32.mrf.mxu0  ;;  %v514_v25 = vsel %vm489_vm2, %v511_v38, %v513_v5  ;;  %v404_v28 = vrot.slane %v3117_v3, 1  ;;  %v457_v30 = vsel %vm432_vm3, %v454_v55, %v456_v8  ;;  %v518_v32 = vrot.slane %v3117_v3, 3 }
  0xf1   :  { %882 = vmatmul.mubr.f32.gmra.mxu1 %v3034_v60  ;;  %1043 = vmatmul.mubr.f32.gmra.mxu0 %v452_v61  ;;  %v299_v14 = vadd.f32 %v2927_v29, %v298_v63  ;;  %v402_v17 = vrot.slane %v3110_v56, 1  ;;  %v516_v19 = vrot.slane %v3110_v56, 3  ;;  %v459_v26 = vrot.slane %v3110_v56, 2 }
  0xf2   :  { %887 = vmatprep.mubr.f32.mxu1 %v398_v52  ;;  %1048 = vmatprep.mubr.f32.mxu0 %v512_v53  ;;  %v2331_v7 = vpop.f32.mrf.mxu0  ;;  %v565_v33 = vrot.slane %v3037_v62, 4  ;;  %v3153_v34 = vmax.f32 %v304_v9, 0.0  ;;  %v461_v36 = vrot.slane %v3117_v3, 2  ;;  %v567_v37 = vrot.slane %v3055_v13, 4  ;;  %v743_v62 = vld [vmem:[%s4126_s3 + $0x460] sm:$0xff] }
  0xf3   :  { %1112 = vmatpush1.msra.mxu1 %v747_v1  ;;  %v3155_v35 = vmax.f32 %v299_v14, 0.0  ;;  %v314_v38 = vadd.f32 %v2331_v7, %v2927_v29  ;;  %v403_v40 = vsel %vm375_vm1, %v401_v15, %v402_v17  ;;  %v517_v41 = vsel %vm489_vm2, %v515_v18, %v516_v19 }
  0xf4   :  { %1113 = vmatprep.subr.mxu1 %v746_v6  ;;  %v308_v16 = vpop.f32.mrf.mxu0  ;;  %v460_v12 = vsel %vm432_vm3, %v458_v23, %v459_v26  ;;  %v405_v43 = vsel %vm375_vm1, %v402_v17, %v404_v28  ;;  %v3177_v46 = vsel %vm546_vm4, %v563_v51, %v565_v33  ;;  %v568_v48 = vrot.slane %v3053_v11, 4 }
  0xf5   :  { %888 = vmatmul.mubr.f32.gmra.mxu1 %v3055_v13  ;;  %1049 = vmatmul.mubr.f32.gmra.mxu0 %v455_v10  ;;  %v309_v39 = vadd.f32 %v2927_v29, %v308_v16  ;;  %v570_v52 = vrot.slane %v3088_v42, 4  ;;  %v406_v53 = vrot.slane %v3155_v35, 1  ;;  %v407_v54 = vrot.slane %v3153_v34, 1 }
  0xf6   :  { %893 = vmatprep.mubr.f32.mxu1 %v400_v24  ;;  %1054 = vmatprep.mubr.f32.mxu0 %v514_v25  ;;  %v2334_v31 = vpop.f32.mrf.mxu0  ;;  %v520_v55 = vrot.slane %v3155_v35, 3  ;;  %v521_v61 = vrot.slane %v3153_v34, 3  ;;  %v462_v60 = vsel %vm432_vm3, %v459_v26, %v461_v36  ;;  %v3193_v42 = vsel %vm546_vm4, %v567_v37, %v568_v48  ;;  %v737_v37 = vld [vmem:[%s4126_s3 + $0x430] sm:$0xff] }
  0xf7   :  { %1114 = vmatpush1.msra.mxu1 %v745_v22  ;;  %v324_v45 = vadd.f32 %v2334_v31, %v2927_v29  ;;  %v3185_v63 = vmax.f32 %v309_v39, 0.0  ;;  %v3195_v51 = vmax.f32 %v314_v38, 0.0  ;;  %v463_v2 = vrot.slane %v3155_v35, 2  ;;  %v738_v22 = vld [vmem:[%s4126_s3 + $0x438] sm:$0xff] }
  0xf8   :  { %1115 = vmatprep.subr.mxu1 %v744_v27  ;;  %v318_v21 = vpop.f32.mrf.mxu0  ;;  %v3205_v5 = vsel %vm546_vm4, %v568_v48, %v570_v52  ;;  %v572_v7 = vrot.slane %v3097_v47, 4  ;;  %v573_v8 = vrot.slane %v3110_v56, 4  ;;  %v575_v9 = vrot.slane %v3117_v3, 4 }
  0xf9   :  { %894 = vmatmul.mubr.f32.gmra.mxu1 %v3053_v11  ;;  %1055 = vmatmul.mubr.f32.gmra.mxu0 %v457_v30  ;;  %v319_v13 = vadd.f32 %v2927_v29, %v318_v21  ;;  %v519_v29 = vsel %vm489_vm2, %v516_v19, %v518_v32  ;;  %v741_v11 = vld [vmem:[%s4126_s3 + $0x450] sm:$0xff]  ;;  %v3207_v6 = vmax.f32 %v324_v45, 0.0  ;;  %v408_v10 = vsel %vm375_vm1, %v406_v53, %v407_v54  ;;  %v734_v53 = vld [vmem:[%s4126_s3 + $0x418] sm:$0xff] }
  0xfa   :  { %899 = vmatprep.mubr.f32.mxu1 %v403_v40  ;;  %1060 = vmatprep.mubr.f32.mxu0 %v517_v41  ;;  %v522_v14 = vsel %vm489_vm2, %v520_v55, %v521_v61  ;;  %v464_v15 = vrot.slane %v3153_v34, 2  ;;  %v577_v16 = vrot.slane %v3155_v35, 4  ;;  %v409_v17 = vrot.slane %v3185_v63, 1  ;;  %v733_v55 = vld [vmem:[%s4126_s3 + $0x410] sm:$0xff] }
  0xfb   :  { %1116 = vmatpush1.msra.mxu1 %v743_v62  ;;  %v3198_v1 = vmax.f32 %v319_v13, 0.0  ;;  %v523_v18 = vrot.slane %v3185_v63, 3  ;;  %v3222_v3 = vsel %vm546_vm4, %v572_v7, %v573_v8  ;;  %v3225_v19 = vsel %vm546_vm4, %v573_v8, %v575_v9  ;;  %v736_v62 = vld [vmem:[%s4126_s3 + $0x428] sm:$0xff]  ;;  %v1442_v7 = vld [vmem:[%s4128_s5 + $0x1c0] sm:$0xff]  ;;  %v1441_v9 = vld [vmem:[%s4128_s5 + $0x1b8] sm:$0xff] }
  0xfc   :  { %1117 = vmatprep.subr.mxu1 %v742_v44  ;;  %v578_v23 = vrot.slane %v3153_v34, 4  ;;  %v580_v24 = vrot.slane %v3185_v63, 4  ;;  %v582_v25 = vrot.slane %v3195_v51, 4  ;;  %v585_v27 = vrot.slane %v3207_v6, 4  ;;  %v1426_v8 = vld [vmem:[%s4128_s5 + $0x140] sm:$0xff] }
  0xfd   :  { %900 = vmatmul.mubr.f32.gmra.mxu1 %v3097_v47  ;;  %1061 = vmatmul.mubr.f32.gmra.mxu0 %v460_v12  ;;  %v739_v47 = vld [vmem:[%s4126_s3 + $0x440] sm:$0xff]  ;;  %v583_v26 = vrot.slane %v3198_v1, 4  ;;  %v465_v32 = vsel %vm432_vm3, %v463_v2, %v464_v15  ;;  %v466_v33 = vrot.slane %v3185_v63, 2  ;;  %v525_v36 = vrot.slane %v3195_v51, 3  ;;  %v1444_v2 = vld [vmem:[%s4128_s5 + $0x1d0] sm:$0xff] }
  0xfe   :  { %905 = vmatprep.mubr.f32.mxu1 %v405_v43  ;;  %1066 = vmatprep.mubr.f32.mxu0 %v519_v29  ;;  %v3238_v28 = vsel %vm546_vm4, %v577_v16, %v578_v23  ;;  %v3241_v30 = vsel %vm546_vm4, %v578_v23, %v580_v24  ;;  %v410_v39 = vsel %vm375_vm1, %v407_v54, %v409_v17  ;;  %v412_v41 = vrot.slane %v3198_v1, 1  ;;  %v735_v43 = vld [vmem:[%s4126_s3 + $0x420] sm:$0xff]  ;;  %v732_v29 = vld [vmem:[%s4126_s3 + $0x408] sm:$0xff]  ;;  %v1440_v16 = vld [vmem:[%s4128_s5 + $0x1b0] sm:$0xff] }
  0xff   :  { %1118 = vmatpush1.msra.mxu1 %v741_v11  ;;  %v3244_v31 = vsel %vm546_vm4, %v582_v25, %v583_v26  ;;  %v3253_v38 = vsel %vm546_vm4, %v583_v26, %v585_v27  ;;  %v524_v40 = vsel %vm489_vm2, %v521_v61, %v523_v18  ;;  %v526_v21 = vrot.slane %v3198_v1, 3  ;;  %v3397_v17 = vld [vmem:[%s4128_s5 + $0x2f0] sm:$0xff]  ;;  %v3424_v23 = vld [vmem:[%s4128_s5 + $0x268] sm:$0xff]  ;;  %v1438_v24 = vld [vmem:[%s4128_s5 + $0x1a0] sm:$0xff] }
 0x100   :  { %1119 = vmatprep.subr.mxu1 %v740_v4  ;;  %v467_v12 = vsel %vm432_vm3, %v464_v15, %v466_v33  ;;  %v469_v13 = vrot.slane %v3198_v1, 2  ;;  %v414_v48 = vrot.slane %v3207_v6, 1  ;;  %v528_v52 = vrot.slane %v3207_v6, 3  ;;  %v1428_v4 = vld [vmem:[%s4128_s5 + $0x150] sm:$0xff]  ;;  %v3388_v15 = vld [vmem:[%s4128_s5 + $0x278] sm:$0xff]  ;;  %4173 = vst [vmem:[#allocation5_spill] sm:$0xff] %v3397_v17 }
 0x101   :  { %906 = vmatmul.mubr.f32.gmra.mxu1 %v3110_v56  ;;  %1067 = vmatmul.mubr.f32.gmra.mxu0 %v462_v60  ;;  %v411_v56 = vrot.slane %v3195_v51, 1  ;;  %v527_v45 = vsel %vm489_vm2, %v525_v36, %v526_v21  ;;  %v731_v60 = vld [vmem:[%s4126_s3 + $0x400] sm:$0xff]  ;;  %4172 = vst [vmem:[#allocation4_spill] sm:$0xff] %v3388_v15  ;;  %v1424_v18 = vld [vmem:[%s4128_s5 + $0x130] sm:$0xff]  ;;  %4176 = vst [vmem:[#allocation8_spill] sm:$0xff] %v3424_v23 }
 0x102   :  { %911 = vmatprep.mubr.f32.mxu1 %v408_v10  ;;  %1072 = vmatprep.mubr.f32.mxu0 %v522_v14  ;;  %v415_v61 = vsel %vm375_vm1, %v412_v41, %v414_v48  ;;  %v529_v63 = vsel %vm489_vm2, %v526_v21, %v528_v52  ;;  %v3379_v10 = vld [vmem:[%s4128_s5 + $0x2f8] sm:$0xff]  ;;  %v3433_v25 = vld [vmem:[%s4128_s5 + $0x2e0] sm:$0xff]  ;;  %v3469_v33 = vld [vmem:[%s4128_s5 + $0x2d0] sm:$0xff] }
 0x103   :  { %1120 = vmatpush1.msra.mxu1 %v739_v47  ;;  %v413_v44 = vsel %vm375_vm1, %v411_v56, %v412_v41  ;;  %4171 = vst [vmem:[#allocation3_spill] sm:$0xff] %v3379_v10  ;;  %v1425_v14 = vld [vmem:[%s4128_s5 + $0x138] sm:$0xff]  ;;  %v3406_v47 = vld [vmem:[%s4128_s5 + $0x270] sm:$0xff]  ;;  %4177 = vst [vmem:[#allocation9_spill] sm:$0xff] %v3433_v25 }
 0x104   :  { %1121 = vmatprep.subr.mxu1 %v738_v22  ;;  %4174 = vst [vmem:[#allocation6_spill] sm:$0xff] %v3406_v47  ;;  %v1423_v22 = vld [vmem:[%s4128_s5 + $0x128] sm:$0xff]  ;;  %v1422_v26 = vld [vmem:[%s4128_s5 + $0x120] sm:$0xff]  ;;  %v1437_v56 = vld [vmem:[%s4128_s5 + $0x198] sm:$0xff] }
 0x105   :  { %912 = vmatmul.mubr.f32.gmra.mxu1 %v3155_v35  ;;  %1073 = vmatmul.mubr.f32.gmra.mxu0 %v465_v32  ;;  %v468_v35 = vrot.slane %v3195_v51, 2  ;;  %v3442_v27 = vld [vmem:[%s4128_s5 + $0x260] sm:$0xff]  ;;  %v1436_v32 = vld [vmem:[%s4128_s5 + $0x190] sm:$0xff]  ;;  %4181 = vst [vmem:[#allocation13_spill] sm:$0xff] %v3469_v33  ;;  %v3496_v41 = vld [vmem:[%s4128_s5 + $0x248] sm:$0xff] }
 0x106   :  { %917 = vmatprep.mubr.f32.mxu1 %v410_v39  ;;  %1078 = vmatprep.mubr.f32.mxu0 %v524_v40  ;;  %4178 = vst [vmem:[#allocation10_spill] sm:$0xff] %v3442_v27  ;;  %v1420_v36 = vld [vmem:[%s4128_s5 + $0x110] sm:$0xff]  ;;  %v3487_v39 = vld [vmem:[%s4128_s5 + $0x2c8] sm:$0xff]  ;;  %4184 = vst [vmem:[#allocation16_spill] sm:$0xff] %v3496_v41 }
 0x107   :  { %1122 = vmatpush1.msra.mxu1 %v737_v37  ;;  %v470_v54 = vsel %vm432_vm3, %v468_v35, %v469_v13  ;;  %v3478_v37 = vld [vmem:[%s4128_s5 + $0x250] sm:$0xff]  ;;  %4183 = vst [vmem:[#allocation15_spill] sm:$0xff] %v3487_v39  ;;  %v1419_v40 = vld [vmem:[%s4128_s5 + $0x108] sm:$0xff]  ;;  %v1434_v21 = vld [vmem:[%s4128_s5 + $0x180] sm:$0xff] }
 0x108   :  { %1123 = vmatprep.subr.mxu1 %v736_v62  ;;  %4182 = vst [vmem:[#allocation14_spill] sm:$0xff] %v3478_v37  ;;  %v3505_v62 = vld [vmem:[%s4128_s5 + $0x2c0] sm:$0xff]  ;;  %v3543_v48 = vld [vmem:[%s4128_s5 + $0x2a8] sm:$0xff] }
 0x109   :  { %918 = vmatmul.mubr.f32.gmra.mxu1 %v3153_v34  ;;  %1079 = vmatmul.mubr.f32.gmra.mxu0 %v467_v12  ;;  %v471_v34 = vrot.slane %v3207_v6, 2  ;;  %v1427_v6 = vld [vmem:[%s4128_s5 + $0x148] sm:$0xff]  ;;  %4185 = vst [vmem:[#allocation17_spill] sm:$0xff] %v3505_v62  ;;  %v1418_v12 = vld [vmem:[%s4128_s5 + $0x100] sm:$0xff]  ;;  %4191 = vst [vmem:[#allocation23_spill] sm:$0xff] %v3543_v48 }
 0x10a   :  { %923 = vmatprep.mubr.f32.mxu1 %v413_v44  ;;  %1084 = vmatprep.mubr.f32.mxu0 %v527_v45  ;;  %v3514_v35 = vld [vmem:[%s4128_s5 + $0x240] sm:$0xff]  ;;  %v3531_v44 = vld [vmem:[%s4128_s5 + $0x2b0] sm:$0xff]  ;;  %v3550_v52 = vld [vmem:[%s4128_s5 + $0x228] sm:$0xff] }
 0x10b   :  { %1124 = vmatpush1.msra.mxu1 %v735_v43  ;;  %v472_v11 = vsel %vm432_vm3, %v469_v13, %v471_v34  ;;  %4186 = vst [vmem:[#allocation18_spill] sm:$0xff] %v3514_v35  ;;  %v3519_v13 = vld [vmem:[%s4128_s5 + $0x2b8] sm:$0xff]  ;;  %4189 = vst [vmem:[#allocation21_spill] sm:$0xff] %v3531_v44  ;;  %v3538_v45 = vld [vmem:[%s4128_s5 + $0x230] sm:$0xff] }
 0x10c   :  { %1125 = vmatprep.subr.mxu1 %v734_v53  ;;  %4187 = vst [vmem:[#allocation19_spill] sm:$0xff] %v3519_v13  ;;  %v3526_v43 = vld [vmem:[%s4128_s5 + $0x238] sm:$0xff]  ;;  %4190 = vst [vmem:[#allocation22_spill] sm:$0xff] %v3538_v45  ;;  %v3555_v53 = vld [vmem:[%s4128_s5 + $0x2a0] sm:$0xff] }
 0x10d   :  { %924 = vmatmul.mubr.f32.gmra.mxu1 %v3195_v51  ;;  %1085 = vmatmul.mubr.f32.gmra.mxu0 %v470_v54  ;;  %v4134_v51 = vmov 0.0   ;;  %4188 = vst [vmem:[#allocation20_spill] sm:$0xff] %v3526_v43  ;;  %4192 = vst [vmem:[#allocation24_spill] sm:$0xff] %v3550_v52  ;;  %v3562_v54 = vld [vmem:[%s4128_s5 + $0x220] sm:$0xff]  ;;  %v3567_v34 = vld [vmem:[%s4128_s5 + $0x298] sm:$0xff] }
 0x10e   :  { %929 = vmatprep.mubr.f32.mxu1 %v415_v61  ;;  %1090 = vmatprep.mubr.f32.mxu0 %v529_v63  ;;  %4193 = vst [vmem:[#allocation25_spill] sm:$0xff] %v3555_v53  ;;  %4194 = vst [vmem:[#allocation26_spill] sm:$0xff] %v3562_v54  ;;  %v3579_v61 = vld [vmem:[%s4128_s5 + $0x290] sm:$0xff] }
 0x10f   :  { %1126 = vmatpush1.msra.mxu1 %v733_v55  ;;  %4195 = vst [vmem:[#allocation27_spill] sm:$0xff] %v3567_v34  ;;  %v3574_v55 = vld [vmem:[%s4128_s5 + $0x218] sm:$0xff]  ;;  %4197 = vst [vmem:[#allocation29_spill] sm:$0xff] %v3579_v61  ;;  %v3586_v63 = vld [vmem:[%s4128_s5 + $0x210] sm:$0xff] }
 0x110   :  { %1127 = vmatprep.subr.mxu1 %v732_v29  ;;  %4196 = vst [vmem:[#allocation28_spill] sm:$0xff] %v3574_v55  ;;  %4198 = vst [vmem:[#allocation30_spill] sm:$0xff] %v3586_v63  ;;  %v3591_v29 = vld [vmem:[%s4128_s5 + $0x288] sm:$0xff] }
 0x111   :  { %930 = vmatmul.mubr.f32.gmra.mxu1 %v3198_v1  ;;  %1091 = vmatmul.mubr.f32.gmra.mxu0 %v472_v11  ;;  %v1429_v1 = vld [vmem:[%s4128_s5 + $0x158] sm:$0xff]  ;;  %4199 = vst [vmem:[#allocation31_spill] sm:$0xff] %v3591_v29  ;;  %v3603_v11 = vld [vmem:[%s4128_s5 + $0x280] sm:$0xff] }
 0x112   :  { %1128 = vmatpush1.msra.mxu1 %v731_v60  ;;  %1161 = vmatprep.mubr.f32.mxu1 %v4134_v51  ;;  %v3598_v60 = vld [vmem:[%s4128_s5 + $0x208] sm:$0xff]  ;;  %4201 = vst [vmem:[#allocation33_spill] sm:$0xff] %v3603_v11 }
 0x113   :  { %2340 = vmatprep.subr.mxu1 %v3379_v10  ;;  %4200 = vst [vmem:[#allocation32_spill] sm:$0xff] %v3598_v60 }
 0x115   :  { %1162 = vmatmul.mubr.f32.vlgmr.msra.gmra.mxu1 %v2955_v0  ;;  %v1449_v0 = vld [vmem:[%s4128_s5 + $0x1f8] sm:$0xff] }
 0x116   :  { %1167 = vmatprep.mubr.f32.mxu1 %v4134_v51  ;;  %2121 = vmatprep.subr.mxu0 %v1449_v0  ;;  %v3610_v0 = vld [vmem:[%s4128_s5 + $0x200] sm:$0xff] }
 0x117   :  { %2356 = vmatpush3.msra.mxu1 %v3388_v15  ;;  %4202 = vst [vmem:[#allocation34_spill] sm:$0xff] %v3610_v0 }
 0x118   :  { %2341 = vmatprep.subr.mxu1 %v3397_v17 }
 0x119   :  { %1168 = vmatmul.mubr.f32.gmra.mxu1 %v2981_v20  ;;  %v1433_v20 = vld [vmem:[%s4128_s5 + $0x178] sm:$0xff] }
 0x11a   :  { %1173 = vmatprep.mubr.f32.mxu1 %v4134_v51  ;;  %2122 = vmatpush3.msra.mxu0 %v1433_v20  ;;  %v1321_v20 = vld [vmem:[%s4128_s5 + $0xf8] sm:$0xff] }
 0x11b   :  { %2357 = vmatpush3.msra.mxu1 %v3406_v47 }
 0x11d   :  { %1174 = vmatmul.mubr.f32.gmra.mxu1 %v3027_v57  ;;  %v1448_v57 = vld [vmem:[%s4128_s5 + $0x1f0] sm:$0xff] }
 0x11e   :  { %1179 = vmatprep.mubr.f32.mxu1 %v4134_v51  ;;  %2123 = vmatprep.subr.mxu0 %v1448_v57 }
 0x121   :  { %1180 = vmatmul.mubr.f32.gmra.mxu1 %v3030_v58  ;;  %v1432_v58 = vld [vmem:[%s4128_s5 + $0x170] sm:$0xff] }
 0x122   :  { %1185 = vmatprep.mubr.f32.mxu1 %v4134_v51  ;;  %2124 = vmatpush3.msra.mxu0 %v1432_v58 }
 0x125   :  { %1186 = vmatmul.mubr.f32.gmra.mxu1 %v3100_v49  ;;  %v1447_v49 = vld [vmem:[%s4128_s5 + $0x1e8] sm:$0xff] }
 0x126   :  { %1191 = vmatprep.mubr.f32.mxu1 %v4134_v51  ;;  %2125 = vmatprep.subr.mxu0 %v1447_v49 }
 0x129   :  { %1192 = vmatmul.mubr.f32.gmra.mxu1 %v3103_v50  ;;  %v1431_v50 = vld [vmem:[%s4128_s5 + $0x168] sm:$0xff] }
 0x12a   :  { %1197 = vmatprep.mubr.f32.mxu1 %v4134_v51  ;;  %2126 = vmatpush3.msra.mxu0 %v1431_v50 }
 0x12d   :  { %1198 = vmatmul.mubr.f32.gmra.mxu1 %v3129_v59  ;;  %v1446_v59 = vld [vmem:[%s4128_s5 + $0x1e0] sm:$0xff] }
 0x12e   :  { %1203 = vmatprep.mubr.f32.mxu1 %v4134_v51  ;;  %2127 = vmatprep.subr.mxu0 %v1446_v59 }
 0x131   :  { %1204 = vmatmul.mubr.f32.gmra.mxu1 %v3177_v46  ;;  %v1430_v46 = vld [vmem:[%s4128_s5 + $0x160] sm:$0xff] }
 0x132   :  { %1209 = vmatprep.mubr.f32.mxu1 %v4134_v51  ;;  %2128 = vmatpush3.msra.mxu0 %v1430_v46 }
 0x135   :  { %1210 = vmatmul.mubr.f32.gmra.mxu1 %v3193_v42  ;;  %v1445_v42 = vld [vmem:[%s4128_s5 + $0x1d8] sm:$0xff] }
 0x136   :  { %1215 = vmatprep.mubr.f32.mxu1 %v4134_v51  ;;  %2129 = vmatprep.subr.mxu0 %v1445_v42 }
 0x137   :  { %2130 = vmatpush3.msra.mxu0 %v1429_v1 }
 0x138   :  { %2131 = vmatprep.subr.mxu0 %v1444_v2 }
 0x139   :  { %1216 = vmatmul.mubr.f32.gmra.mxu1 %v3205_v5  ;;  %v1443_v5 = vld [vmem:[%s4128_s5 + $0x1c8] sm:$0xff]  ;;  %2132 = vmatpush3.msra.mxu0 %v1428_v4 }
 0x13a   :  { %1221 = vmatprep.mubr.f32.mxu1 %v4134_v51  ;;  %2133 = vmatprep.subr.mxu0 %v1443_v5 }
 0x13b   :  { %2134 = vmatpush3.msra.mxu0 %v1427_v6 }
 0x13c   :  { %2135 = vmatprep.subr.mxu0 %v1442_v7 }
 0x13d   :  { %1222 = vmatmul.mubr.f32.gmra.mxu1 %v3222_v3  ;;  %2136 = vmatpush3.msra.mxu0 %v1426_v8  ;;  %v1439_v3 = vld [vmem:[%s4128_s5 + $0x1a8] sm:$0xff] }
 0x13e   :  { %1227 = vmatprep.mubr.f32.mxu1 %v4134_v51  ;;  %2137 = vmatprep.subr.mxu0 %v1441_v9 }
 0x13f   :  { %2138 = vmatpush3.msra.mxu0 %v1425_v14 }
 0x140   :  { %2139 = vmatprep.subr.mxu0 %v1440_v16 }
 0x141   :  { %1228 = vmatmul.mubr.f32.gmra.mxu1 %v3225_v19  ;;  %2140 = vmatpush3.msra.mxu0 %v1424_v18  ;;  %v3415_v19 = vld [vmem:[%s4128_s5 + $0x2e8] sm:$0xff] }
 0x142   :  { %1233 = vmatprep.mubr.f32.mxu1 %v4134_v51  ;;  %4175 = vst [vmem:[#allocation7_spill] sm:$0xff] %v3415_v19  ;;  %2141 = vmatprep.subr.mxu0 %v1439_v3 }
 0x143   :  { %2342 = vmatprep.subr.mxu1 %v3415_v19  ;;  %2142 = vmatpush3.msra.mxu0 %v1423_v22 }
 0x144   :  { %2358 = vmatpush3.msra.mxu1 %v3424_v23  ;;  %2143 = vmatprep.subr.mxu0 %v1438_v24 }
 0x145   :  { %1234 = vmatmul.mubr.f32.gmra.mxu1 %v3238_v28  ;;  %2343 = vmatprep.subr.mxu1 %v3433_v25  ;;  %v3451_v28 = vld [vmem:[%s4128_s5 + $0x2d8] sm:$0xff] }
 0x146   :  { %1239 = vmatprep.mubr.f32.mxu1 %v4134_v51  ;;  %2144 = vmatpush3.msra.mxu0 %v1422_v26  ;;  %4179 = vst [vmem:[#allocation11_spill] sm:$0xff] %v3451_v28 }
 0x147   :  { %2359 = vmatpush3.msra.mxu1 %v3442_v27  ;;  %2145 = vmatprep.subr.mxu0 %v1437_v56 }
 0x148   :  { %2344 = vmatprep.subr.mxu1 %v3451_v28 }
 0x149   :  { %1240 = vmatmul.mubr.f32.gmra.mxu1 %v3241_v30  ;;  %v1421_v30 = vld [vmem:[%s4128_s5 + $0x118] sm:$0xff] }
 0x14a   :  { %1245 = vmatprep.mubr.f32.mxu1 %v4134_v51  ;;  %2146 = vmatpush3.msra.mxu0 %v1421_v30 }
 0x14b   :  { %2147 = vmatprep.subr.mxu0 %v1436_v32 }
 0x14c   :  { %2148 = vmatpush3.msra.mxu0 %v1420_v36 }
 0x14d   :  { %1246 = vmatmul.mubr.f32.gmra.mxu1 %v3244_v31  ;;  %v3460_v31 = vld [vmem:[%s4128_s5 + $0x258] sm:$0xff] }
 0x14e   :  { %1251 = vmatprep.mubr.f32.mxu1 %v4134_v51  ;;  %4180 = vst [vmem:[#allocation12_spill] sm:$0xff] %v3460_v31  ;;  %2360 = vmatpush3.msra.mxu1 %v3460_v31 }
 0x14f   :  { %2345 = vmatprep.subr.mxu1 %v3469_v33 }
 0x150   :  { %2361 = vmatpush3.msra.mxu1 %v3478_v37 }
 0x151   :  { %1252 = vmatmul.mubr.f32.gmra.mxu1 %v3253_v38  ;;  %v1435_v38 = vld [vmem:[%s4128_s5 + $0x188] sm:$0xff]  ;;  %2346 = vmatprep.subr.mxu1 %v3487_v39 }
 0x152   :  { %2149 = vmatprep.subr.mxu0 %v1435_v38  ;;  %2362 = vmatpush3.msra.mxu1 %v3496_v41 }
 0x153   :  { %2150 = vmatpush3.msra.mxu0 %v1419_v40  ;;  %2347 = vmatprep.subr.mxu1 %v3505_v62 }
 0x154   :  { %2151 = vmatprep.subr.mxu0 %v1434_v21  ;;  %2363 = vmatpush3.msra.mxu1 %v3514_v35 }
 0x155   :  { %2152 = vmatpush3.msra.mxu0 %v1418_v12  ;;  %2348 = vmatprep.subr.mxu1 %v3519_v13 }
 0x156   :  { %2364 = vmatpush3.msra.mxu1 %v3526_v43  ;;  %2177 = vmatprep.subr.mxu0 %v1321_v20  ;;  %v763_v43 = vld [vmem:[%s4129_s4] sm:$0x3] }
 0x157   :  { %2349 = vmatprep.subr.mxu1 %v3531_v44 }
 0x158   :  { %2365 = vmatpush3.msra.mxu1 %v3538_v45 }
 0x159   :  { %2350 = vmatprep.subr.mxu1 %v3543_v48 }
 0x15a   :  { %2366 = vmatpush3.msra.mxu1 %v3550_v52 }
 0x15b   :  { %2351 = vmatprep.subr.mxu1 %v3555_v53 }
 0x15c   :  { %2367 = vmatpush3.msra.mxu1 %v3562_v54 }
 0x15d   :  { %2352 = vmatprep.subr.mxu1 %v3567_v34 }
 0x15e   :  { %2368 = vmatpush3.msra.mxu1 %v3574_v55 }
 0x15f   :  { %2353 = vmatprep.subr.mxu1 %v3579_v61 }
 0x160   :  { %2369 = vmatpush3.msra.mxu1 %v3586_v63  ;;  %v765_v63 = vlaneseq }
 0x161   :  { %2354 = vmatprep.subr.mxu1 %v3591_v29 }
 0x162   :  { %2370 = vmatpush3.msra.mxu1 %v3598_v60  ;;  %v3680_v54 = vshrl.u32 %v765_v63, 7 }
 0x163   :  { %2355 = vmatprep.subr.mxu1 %v3603_v11 }
 0x164   :  { %2371 = vmatpush3.msra.mxu1 %v3610_v0  ;;  %4203 = vst [vmem:[#allocation35_spill] sm:$0xff] %v3680_v54  ;;  %v771_v48 = vsub.s32 1, %v3680_v54  ;;  %v4164_v44 = vsub.s32 0, %v3680_v54 }
 0x166   :  { %v3697_v63 = vrot.slane %v763_v43, %v771_v48  ;;  %v3703_v41 = vrot.slane %v763_v43, %v4164_v44 }
 0x195   :  { %v841_v57 = vpop.f32.mrf.mxu1  ;;  %v3616_v58 = vpop.f32.mrf.mxu0 }
 0x196   :  { %v842_v28 = vadd.f32 %v841_v57, %v3703_v41 }
 0x197   :  { %v843_v49 = vpop.f32.mrf.mxu1  ;;  %v1004_v50 = vpop.f32.mrf.mxu0 }
 0x198   :  { %v844_v33 = vadd.f32 %v843_v49, %v3697_v63  ;;  %v1003_v44 = vadd.f32 %v3616_v58, %v842_v28 }
 0x199   :  { %v847_v59 = vpop.f32.mrf.mxu1  ;;  %v1008_v42 = vpop.f32.mrf.mxu0 }
 0x19a   :  { %v848_v27 = vadd.f32 %v847_v59, %v3703_v41  ;;  %v1005_v54 = vadd.f32 %v1004_v50, %v844_v33 }
 0x19b   :  { %v849_v46 = vpop.f32.mrf.mxu1  ;;  %v1010_v4 = vpop.f32.mrf.mxu0 }
 0x19c   :  { %v850_v23 = vadd.f32 %v849_v46, %v3697_v63  ;;  %v1009_v19 = vadd.f32 %v1008_v42, %v848_v27 }
 0x19d   :  { %v3618_v1 = vpop.f32.mrf.mxu1  ;;  %v3626_v7 = vpop.f32.mrf.mxu0 }
 0x19e   :  { %v1011_v15 = vadd.f32 %v1010_v4, %v850_v23  ;;  %v854_v46 = vadd.f32 %v3618_v1, %v3703_v41 }
 0x19f   :  { %v3620_v2 = vpop.f32.mrf.mxu1  ;;  %v3632_v14 = vpop.f32.mrf.mxu0 }
 0x1a0   :  { %v856_v57 = vadd.f32 %v3620_v2, %v3697_v63  ;;  %v1015_v1 = vadd.f32 %v3626_v7, %v854_v46  ;;  %v1305_v46 = vld [vmem:[%s4128_s5 + $0x78] sm:$0xff] }
 0x1a1   :  { %v3622_v5 = vpop.f32.mrf.mxu1  ;;  %v3638_v3 = vpop.f32.mrf.mxu0 }
 0x1a2   :  { %v860_v33 = vadd.f32 %v3622_v5, %v3703_v41  ;;  %v1017_v50 = vadd.f32 %v3632_v14, %v856_v57 }
 0x1a3   :  { %v3624_v6 = vpop.f32.mrf.mxu1  ;;  %v3644_v26 = vpop.f32.mrf.mxu0 }
 0x1a4   :  { %v862_v23 = vadd.f32 %v3624_v6, %v3697_v63 }
 0x1a5   :  { %v3628_v8 = vpop.f32.mrf.mxu1  ;;  %v3650_v32 = vpop.f32.mrf.mxu0 }
 0x1a7   :  { %v3630_v9 = vpop.f32.mrf.mxu1  ;;  %v3656_v40 = vpop.f32.mrf.mxu0 }
 0x1a8   :  { %v868_v7 = vadd.f32 %v3630_v9, %v3697_v63 }
 0x1a9   :  { %v3634_v16 = vpop.f32.mrf.mxu1  ;;  %v3662_v20 = vpop.f32.mrf.mxu0 }
 0x1ab   :  { %v3636_v18 = vpop.f32.mrf.mxu1  ;;  %v3668_v11 = vpop.f32.mrf.mxu0 }
 0x1ad   :  { %v3640_v22 = vpop.f32.mrf.mxu1  ;;  %v3674_v61 = vpop.f32.mrf.mxu0 }
 0x1af   :  { %v3642_v24 = vpop.f32.mrf.mxu1  ;;  %v3682_v53 = vpop.f32.mrf.mxu0 }
 0x1b1   :  { %v3646_v56 = vpop.f32.mrf.mxu1  ;;  %v3693_v13 = vpop.f32.mrf.mxu0 }
 0x1b3   :  { %v3648_v30 = vpop.f32.mrf.mxu1  ;;  %v3705_v39 = vpop.f32.mrf.mxu0 }
 0x1b5   :  { %v3652_v36 = vpop.f32.mrf.mxu1  ;;  %v3714_v48 = vpop.f32.mrf.mxu0 }
 0x1b7   :  { %v3654_v38 = vpop.f32.mrf.mxu1  ;;  %v3718_v47 = vpop.f32.mrf.mxu0 }
 0x1b9   :  { %v3658_v21 = vpop.f32.mrf.mxu1 }
 0x1bb   :  { %v3660_v12 = vpop.f32.mrf.mxu1 }
 0x1bd   :  { %v3664_v51 = vpop.f32.mrf.mxu1 }
 0x1bf   :  { %v3666_v0 = vpop.f32.mrf.mxu1 }
 0x1c1   :  { %v3670_v60 = vpop.f32.mrf.mxu1 }
 0x1c3   :  { %v3672_v29 = vpop.f32.mrf.mxu1 }
 0x1c5   :  { %v3676_v55 = vpop.f32.mrf.mxu1 }
 0x1c7   :  { %v3678_v34 = vpop.f32.mrf.mxu1 }
 0x1c9   :  { %v3684_v52 = vpop.f32.mrf.mxu1 }
 0x1cb   :  { %v3687_v45 = vpop.f32.mrf.mxu1 }
 0x1cd   :  { %v3695_v35 = vpop.f32.mrf.mxu1 }
 0x1cf   :  { %v3699_v62 = vpop.f32.mrf.mxu1 }
 0x1d1   :  { %v3707_v37 = vpop.f32.mrf.mxu1 }
 0x1d3   :  { %v3710_v31 = vpop.f32.mrf.mxu1 }
 0x1d4   :  { %4204 = vst [vmem:[#allocation36_spill] sm:$0xff] %v3710_v31 }
 0x1d5   :  { %v1163_v25 = vpop.f32.mrf.mxu1 }
 0x1d6   :  { %v1164_v31 = vadd.f32 %v1163_v25, %v1003_v44  ;;  %v3733_v25 = vpop.f32.mrf.mxu0 }
 0x1d7   :  { %v1165_v43 = vpop.f32.mrf.mxu1 }
 0x1d8   :  { %v1166_v17 = vadd.f32 %v1165_v43, %v1005_v54  ;;  %v3737_v54 = vmax.f32 %v1164_v31, 0.0  ;;  %v866_v31 = vadd.f32 %v3628_v8, %v3703_v41  ;;  %v3750_v5 = vpop.f32.mrf.mxu0 }
 0x1d9   :  { %v1169_v49 = vpop.f32.mrf.mxu1 }
 0x1da   :  { %v3720_v10 = vadd.f32 %v1169_v49, %v1009_v19  ;;  %v3735_v19 = vmax.f32 %v1166_v17, 0.0  ;;  %v1023_v17 = vadd.f32 %v3644_v26, %v862_v23  ;;  %v872_v26 = vadd.f32 %v3634_v16, %v3703_v41  ;;  %v3770_v16 = vpop.f32.mrf.mxu0 }
 0x1db   :  { %v1171_v59 = vpop.f32.mrf.mxu1 }
 0x1dc   :  { %v1260_v27 = vmax.f32 %v3720_v10, 0.0  ;;  %v3729_v28 = vadd.f32 %v1171_v59, %v1011_v15  ;;  %v1021_v15 = vadd.f32 %v3638_v3, %v860_v33  ;;  %v1357_v6 = vrot.slane %v3735_v19, 1  ;;  %v4238_v10 = vld [vmem:[#allocation34_spill] sm:$0xff] }
 0x1dd   :  { %v1175_v44 = vpop.f32.mrf.mxu1  ;;  %v1354_v3 = vrot.slane %v3737_v54, 1 }
 0x1de   :  { %v1261_v58 = vmax.f32 %v3729_v28, 0.0  ;;  %v1355_v2 = vrot.slane %v1260_v27, 1  ;;  %v1176_v49 = vadd.f32 %v1175_v44, %v1015_v1  ;;  %v1320_v44 = vld [vmem:[%s4128_s5 + $0xf0] sm:$0xff]  ;;  %v4234_v28 = vld [vmem:[#allocation31_spill] sm:$0xff] }
 0x1df   :  { %v1177_v42 = vpop.f32.mrf.mxu1 }
 0x1e0   :  { %v1358_v4 = vrot.slane %v1261_v58, 1  ;;  %v1178_v14 = vadd.f32 %v1177_v42, %v1017_v50  ;;  %v1356_v9 = vsel %vm375_vm1, %v1354_v3, %v1355_v2  ;;  %v1027_v50 = vadd.f32 %v3650_v32, %v866_v31  ;;  %v1319_v32 = vld [vmem:[%s4128_s5 + $0xe8] sm:$0xff] }
 0x1e1   :  { %v1181_v43 = vpop.f32.mrf.mxu1  ;;  %v874_v2 = vadd.f32 %v3636_v18, %v3697_v63  ;;  %v1033_v31 = vadd.f32 %v3662_v20, %v872_v26  ;;  %v1303_v18 = vld [vmem:[%s4128_s5 + $0x68] sm:$0xff]  ;;  %v1318_v20 = vld [vmem:[%s4128_s5 + $0xe0] sm:$0xff]  ;;  %v884_v26 = vadd.f32 %v3646_v56, %v3703_v41  ;;  %v1317_v56 = vld [vmem:[%s4128_s5 + $0xd8] sm:$0xff] }
 0x1e2   :  { %v3756_v57 = vadd.f32 %v1181_v43, %v1021_v15  ;;  %v1359_v8 = vsel %vm375_vm1, %v1357_v6, %v1358_v4  ;;  %v3772_v42 = vmax.f32 %v1178_v14, 0.0  ;;  %v1304_v15 = vld [vmem:[%s4128_s5 + $0x70] sm:$0xff]  ;;  %v1029_v4 = vadd.f32 %v3656_v40, %v868_v7 }
 0x1e3   :  { %v1183_v59 = vpop.f32.mrf.mxu1  ;;  %1514 = vmatprep.mubr.f32.mxu0 %v1359_v8  ;;  %v878_v14 = vadd.f32 %v3640_v22, %v3703_v41  ;;  %v880_v22 = vadd.f32 %v3642_v24, %v3697_v63  ;;  %v3800_v8 = vpop.f32.mrf.mxu0 }
 0x1e4   :  { %v4170_v33 = vmax.f32 %v3756_v57, 0.0  ;;  %v1184_v23 = vadd.f32 %v1183_v59, %v1023_v17  ;;  %1515 = vmatmul.mubr.f32.vlgmr.msra.gmra.mxu0 %v1356_v9  ;;  %v3780_v17 = vmax.f32 %v1176_v49, 0.0 }
 0x1e5   :  { %v1187_v1 = vpop.f32.mrf.mxu1  ;;  %2178 = vmatpush3.msra.mxu0 %v1305_v46  ;;  %v1363_v46 = vrot.slane %v3772_v42, 1 }
 0x1e6   :  { %v1265_v6 = vmax.f32 %v1184_v23, 0.0  ;;  %v1188_v43 = vadd.f32 %v1187_v1, %v1027_v50  ;;  %2179 = vmatprep.subr.mxu0 %v1320_v44  ;;  %v1361_v40 = vrot.slane %v4170_v33, 1  ;;  %v1669_v23 = vrot.slane %v3772_v42, 2  ;;  %v1302_v44 = vld [vmem:[%s4128_s5 + $0x60] sm:$0xff] }
 0x1e7   :  { %v1189_v3 = vpop.f32.mrf.mxu1  ;;  %2180 = vmatpush3.msra.mxu0 %v1304_v15  ;;  %v1035_v50 = vadd.f32 %v3668_v11, %v874_v2  ;;  %v1360_v1 = vrot.slane %v3780_v17, 1  ;;  %v1039_v15 = vadd.f32 %v3674_v61, %v878_v14  ;;  %v1301_v11 = vld [vmem:[%s4128_s5 + $0x58] sm:$0xff]  ;;  %v1316_v14 = vld [vmem:[%s4128_s5 + $0xd0] sm:$0xff] }
 0x1e8   :  { %v1364_v7 = vrot.slane %v1265_v6, 1  ;;  %v1670_v49 = vrot.slane %v1265_v6, 2  ;;  %v1190_v59 = vadd.f32 %v1189_v3, %v1029_v4  ;;  %2181 = vmatprep.subr.mxu0 %v1319_v32  ;;  %v3813_v4 = vmax.f32 %v1188_v43, 0.0 }
 0x1e9   :  { %v1193_v9 = vpop.f32.mrf.mxu1  ;;  %2182 = vmatpush3.msra.mxu0 %v1303_v18  ;;  %v1362_v61 = vsel %vm375_vm1, %v1360_v1, %v1361_v40  ;;  %v1041_v43 = vadd.f32 %v3682_v53, %v880_v22  ;;  %v1300_v40 = vld [vmem:[%s4128_s5 + $0x50] sm:$0xff]  ;;  %v896_v1 = vadd.f32 %v3658_v21, %v3703_v41 }
 0x1ea   :  { %v1194_v24 = vadd.f32 %v1193_v9, %v1033_v31  ;;  %v1365_v32 = vsel %vm375_vm1, %v1363_v46, %v1364_v7  ;;  %2183 = vmatprep.subr.mxu0 %v1318_v20  ;;  %v3820_v2 = vsel %vm432_vm3, %v1669_v23, %v1670_v49  ;;  %v3822_v31 = vmax.f32 %v1190_v59, 0.0  ;;  %v3832_v20 = vpop.f32.mrf.mxu0 }
 0x1eb   :  { %v1195_v6 = vpop.f32.mrf.mxu1  ;;  %1519 = vmatprep.mubr.f32.mxu0 %v1365_v32  ;;  %2184 = vmatpush3.msra.mxu0 %v1302_v44  ;;  %v1045_v7 = vadd.f32 %v3693_v13, %v884_v26  ;;  %v886_v49 = vadd.f32 %v3648_v30, %v3697_v63  ;;  %v890_v46 = vadd.f32 %v3652_v36, %v3703_v41  ;;  %v1315_v13 = vld [vmem:[%s4128_s5 + $0xc8] sm:$0xff]  ;;  %v1366_v22 = vrot.slane %v3813_v4, 1 }
 0x1ec   :  { %v1268_v3 = vmax.f32 %v1194_v24, 0.0  ;;  %v1196_v18 = vadd.f32 %v1195_v6, %v1035_v50  ;;  %1520 = vmatmul.mubr.f32.gmra.mxu0 %v1362_v61  ;;  %2185 = vmatprep.subr.mxu0 %v1317_v56  ;;  %v892_v30 = vadd.f32 %v3654_v38, %v3697_v63  ;;  %v1672_v26 = vrot.slane %v3813_v4, 2  ;;  %v1299_v36 = vld [vmem:[%s4128_s5 + $0x48] sm:$0xff]  ;;  %v1314_v38 = vld [vmem:[%s4128_s5 + $0xc0] sm:$0xff]  ;;  %v3855_v32 = vpop.f32.mrf.mxu0 }
 0x1ed   :  { %v1199_v59 = vpop.f32.mrf.mxu1  ;;  %2186 = vmatpush3.msra.mxu0 %v1301_v11  ;;  %v1369_v24 = vrot.slane %v3822_v31, 1  ;;  %v1047_v21 = vadd.f32 %v3705_v39, %v886_v49  ;;  %v1313_v39 = vld [vmem:[%s4128_s5 + $0xb8] sm:$0xff]  ;;  %v1057_v49 = vadd.f32 %v3733_v25, %v896_v1 }
 0x1ee   :  { %v1367_v23 = vrot.slane %v1268_v3, 1  ;;  %v1673_v9 = vrot.slane %v1268_v3, 2  ;;  %v1269_v53 = vmax.f32 %v1196_v18, 0.0  ;;  %v1200_v44 = vadd.f32 %v1199_v59, %v1039_v15  ;;  %2187 = vmatprep.subr.mxu0 %v1316_v14 }
 0x1ef   :  { %v1201_v50 = vpop.f32.mrf.mxu1  ;;  %2188 = vmatpush3.msra.mxu0 %v1300_v40  ;;  %v1675_v15 = vrot.slane %v3822_v31, 2 }
 0x1f0   :  { %v1370_v56 = vrot.slane %v1269_v53, 1  ;;  %v1676_v6 = vrot.slane %v1269_v53, 2  ;;  %v1202_v11 = vadd.f32 %v1201_v50, %v1041_v43  ;;  %v1368_v18 = vsel %vm375_vm1, %v1366_v22, %v1367_v23  ;;  %2189 = vmatprep.subr.mxu0 %v1315_v13  ;;  %v1298_v43 = vld [vmem:[%s4128_s5 + $0x40] sm:$0xff] }
 0x1f1   :  { %v1205_v3 = vpop.f32.mrf.mxu1  ;;  %v1674_v61 = vsel %vm432_vm3, %v1672_v26, %v1673_v9  ;;  %2190 = vmatpush3.msra.mxu0 %v1299_v36  ;;  %v3861_v59 = vmax.f32 %v1200_v44, 0.0  ;;  %v1051_v23 = vadd.f32 %v3714_v48, %v890_v46  ;;  %v898_v22 = vadd.f32 %v3660_v12, %v3697_v63  ;;  %v3876_v26 = vpop.f32.mrf.mxu0  ;;  %v1312_v12 = vld [vmem:[%s4128_s5 + $0xb0] sm:$0xff] }
 0x1f2   :  { %v1206_v14 = vadd.f32 %v1205_v3, %v1045_v7  ;;  %v1371_v53 = vsel %vm375_vm1, %v1369_v24, %v1370_v56  ;;  %v1677_v33 = vsel %vm432_vm3, %v1675_v15, %v1676_v6  ;;  %2191 = vmatprep.subr.mxu0 %v1314_v38  ;;  %v1053_v7 = vadd.f32 %v3718_v47, %v892_v30 }
 0x1f3   :  { %v1207_v40 = vpop.f32.mrf.mxu1  ;;  %1524 = vmatprep.mubr.f32.mxu0 %v1371_v53  ;;  %1830 = vmatprep.mubr.f32.mxu1 %v1677_v33  ;;  %v3878_v44 = vmax.f32 %v1202_v11, 0.0  ;;  %v1297_v33 = vld [vmem:[%s4128_s5 + $0x38] sm:$0xff]  ;;  %v902_v46 = vadd.f32 %v3664_v51, %v3703_v41  ;;  %v904_v50 = vadd.f32 %v3666_v0, %v3697_v63  ;;  %v1372_v36 = vrot.slane %v3861_v59, 1  ;;  %v1296_v51 = vld [vmem:[%s4128_s5 + $0x30] sm:$0xff]  ;;  %v1311_v0 = vld [vmem:[%s4128_s5 + $0xa8] sm:$0xff]  ;;  %v3900_v3 = vpop.f32.mrf.mxu0 }
 0x1f4   :  { %v1272_v9 = vmax.f32 %v1206_v14, 0.0  ;;  %v1208_v13 = vadd.f32 %v1207_v40, %v1047_v21  ;;  %1525 = vmatmul.mubr.f32.gmra.mxu0 %v1368_v18  ;;  %1831 = vmatmul.mubr.f32.vlgmr.msra.gmra.mxu1 %v1674_v61  ;;  %v1678_v1 = vrot.slane %v3861_v59, 2  ;;  %v908_v6 = vadd.f32 %v3670_v60, %v3703_v41 }
 0x1f5   :  { %v1211_v48 = vpop.f32.mrf.mxu1  ;;  %2192 = vmatpush3.msra.mxu0 %v1298_v43  ;;  %v1375_v18 = vrot.slane %v3878_v44, 1  ;;  %v1681_v61 = vrot.slane %v3878_v44, 2  ;;  %v1059_v60 = vadd.f32 %v3750_v5, %v898_v22  ;;  %v1310_v5 = vld [vmem:[%s4128_s5 + $0xa0] sm:$0xff]  ;;  %v1065_v22 = vadd.f32 %v3800_v8, %v904_v50 }
 0x1f6   :  { %v1373_v47 = vrot.slane %v1272_v9, 1  ;;  %v1679_v30 = vrot.slane %v1272_v9, 2  ;;  %v1273_v25 = vmax.f32 %v1208_v13, 0.0  ;;  %v1212_v24 = vadd.f32 %v1211_v48, %v1051_v23  ;;  %2193 = vmatprep.subr.mxu0 %v1313_v39  ;;  %v1295_v39 = vld [vmem:[%s4128_s5 + $0x28] sm:$0xff] }
 0x1f7   :  { %v1213_v56 = vpop.f32.mrf.mxu1  ;;  %2194 = vmatpush3.msra.mxu0 %v1297_v33  ;;  %v914_v8 = vadd.f32 %v3676_v55, %v3703_v41  ;;  %v1308_v55 = vld [vmem:[%s4128_s5 + $0x90] sm:$0xff] }
 0x1f8   :  { %v1376_v38 = vrot.slane %v1273_v25, 1  ;;  %v1682_v15 = vrot.slane %v1273_v25, 2  ;;  %v1214_v11 = vadd.f32 %v1213_v56, %v1053_v7  ;;  %v1374_v14 = vsel %vm375_vm1, %v1372_v36, %v1373_v47  ;;  %2195 = vmatprep.subr.mxu0 %v1312_v12  ;;  %v1294_v12 = vld [vmem:[%s4128_s5 + $0x20] sm:$0xff] }
 0x1f9   :  { %v1217_v21 = vpop.f32.mrf.mxu1  ;;  %v1680_v40 = vsel %vm432_vm3, %v1678_v1, %v1679_v30  ;;  %2196 = vmatpush3.msra.mxu0 %v1296_v51  ;;  %v3907_v43 = vmax.f32 %v1212_v24, 0.0  ;;  %v1069_v47 = vadd.f32 %v3832_v20, %v908_v6  ;;  %v1080_v30 = vpop.f32.mrf.mxu0  ;;  %v910_v36 = vadd.f32 %v3672_v29, %v3697_v63  ;;  %v1293_v29 = vld [vmem:[%s4128_s5 + $0x18] sm:$0xff] }
 0x1fa   :  { %v1218_v53 = vadd.f32 %v1217_v21, %v1057_v49  ;;  %v1377_v9 = vsel %vm375_vm1, %v1375_v18, %v1376_v38  ;;  %v1683_v13 = vsel %vm432_vm3, %v1681_v61, %v1682_v15  ;;  %2197 = vmatprep.subr.mxu0 %v1311_v0  ;;  %v3914_v7 = vmax.f32 %v1214_v11, 0.0 }
 0x1fb   :  { %v1219_v23 = vpop.f32.mrf.mxu1  ;;  %1529 = vmatprep.mubr.f32.mxu0 %v1377_v9  ;;  %1835 = vmatprep.mubr.f32.mxu1 %v1683_v13  ;;  %v1063_v49 = vadd.f32 %v3770_v16, %v902_v46  ;;  %v1309_v16 = vld [vmem:[%s4128_s5 + $0x98] sm:$0xff]  ;;  %v1378_v20 = vrot.slane %v3907_v43, 1  ;;  %v1684_v46 = vrot.slane %v3907_v43, 2  ;;  %v916_v6 = vadd.f32 %v3678_v34, %v3697_v63  ;;  %v1082_v0 = vpop.f32.mrf.mxu0 }
 0x1fc   :  { %v1276_v48 = vmax.f32 %v1218_v53, 0.0  ;;  %v1220_v33 = vadd.f32 %v1219_v23, %v1059_v60  ;;  %1530 = vmatmul.mubr.f32.gmra.mxu0 %v1374_v14  ;;  %1836 = vmatmul.mubr.f32.gmra.mxu1 %v1680_v40  ;;  %v1381_v38 = vrot.slane %v3914_v7, 1  ;;  %v1687_v18 = vrot.slane %v3914_v7, 2 }
 0x1fd   :  { %v1223_v25 = vpop.f32.mrf.mxu1  ;;  %2198 = vmatpush3.msra.mxu0 %v1295_v39  ;;  %v1071_v34 = vadd.f32 %v3855_v32, %v910_v36  ;;  %v920_v53 = vadd.f32 %v3684_v52, %v3703_v41  ;;  %v1307_v52 = vld [vmem:[%s4128_s5 + $0x88] sm:$0xff]  ;;  %v1075_v32 = vadd.f32 %v3876_v26, %v914_v8  ;;  %v922_v36 = vadd.f32 %v3687_v45, %v3697_v63  ;;  %v1306_v26 = vld [vmem:[%s4128_s5 + $0x80] sm:$0xff] }
 0x1fe   :  { %v1379_v1 = vrot.slane %v1276_v48, 1  ;;  %v1685_v24 = vrot.slane %v1276_v48, 2  ;;  %v1277_v56 = vmax.f32 %v1220_v33, 0.0  ;;  %v1224_v50 = vadd.f32 %v1223_v25, %v1063_v49  ;;  %2199 = vmatprep.subr.mxu0 %v1310_v5  ;;  %v1292_v48 = vld [vmem:[%s4128_s5 + $0x10] sm:$0xff]  ;;  %v1290_v45 = vld [vmem:[%s4128_s5] sm:$0xff] }
 0x1ff   :  { %v1225_v51 = vpop.f32.mrf.mxu1  ;;  %2200 = vmatpush3.msra.mxu0 %v1294_v12  ;;  %v1077_v49 = vadd.f32 %v3900_v3, %v916_v6  ;;  %v1291_v12 = vld [vmem:[%s4128_s5 + $0x8] sm:$0xff]  ;;  %v1081_v3 = vadd.f32 %v1080_v30, %v920_v53 }
 0x200   :  { %v1382_v15 = vrot.slane %v1277_v56, 1  ;;  %v1688_v11 = vrot.slane %v1277_v56, 2  ;;  %v1226_v61 = vadd.f32 %v1225_v51, %v1065_v22  ;;  %v1380_v14 = vsel %vm375_vm1, %v1378_v20, %v1379_v1  ;;  %2201 = vmatprep.subr.mxu0 %v1309_v16  ;;  %v1086_v22 = vpop.f32.mrf.mxu0 }
 0x201   :  { %v1229_v21 = vpop.f32.mrf.mxu1  ;;  %v1686_v40 = vsel %vm432_vm3, %v1684_v46, %v1685_v24  ;;  %2202 = vmatpush3.msra.mxu0 %v1293_v29  ;;  %v3949_v23 = vmax.f32 %v1224_v50, 0.0  ;;  %v928_v50 = vadd.f32 %v3699_v62, %v3697_v63 }
 0x202   :  { %v1230_v60 = vadd.f32 %v1229_v21, %v1069_v47  ;;  %v1383_v13 = vsel %vm375_vm1, %v1381_v38, %v1382_v15  ;;  %v1689_v39 = vsel %vm432_vm3, %v1687_v18, %v1688_v11  ;;  %2203 = vmatprep.subr.mxu0 %v1308_v55  ;;  %v3961_v47 = vmax.f32 %v1226_v61, 0.0  ;;  %v1088_v38 = vpop.f32.mrf.mxu0 }
 0x203   :  { %v1231_v9 = vpop.f32.mrf.mxu1  ;;  %1534 = vmatprep.mubr.f32.mxu0 %v1383_v13  ;;  %1840 = vmatprep.mubr.f32.mxu1 %v1689_v39  ;;  %v1384_v16 = vrot.slane %v3949_v23, 1  ;;  %v1690_v8 = vrot.slane %v3949_v23, 2  ;;  %v1083_v61 = vadd.f32 %v1082_v0, %v922_v36  ;;  %v926_v21 = vadd.f32 %v3695_v35, %v3703_v41 }
 0x204   :  { %v1280_v33 = vmax.f32 %v1230_v60, 0.0  ;;  %v1232_v5 = vadd.f32 %v1231_v9, %v1071_v34  ;;  %1535 = vmatmul.mubr.f32.gmra.mxu0 %v1380_v14  ;;  %1841 = vmatmul.mubr.f32.gmra.mxu1 %v1686_v40  ;;  %v1387_v30 = vrot.slane %v3961_v47, 1  ;;  %v1693_v15 = vrot.slane %v3961_v47, 2  ;;  %v4205_v9 = vld [vmem:[#allocation3_spill] sm:$0xff] }
 0x205   :  { %v1235_v25 = vpop.f32.mrf.mxu1  ;;  %2204 = vmatpush3.msra.mxu0 %v1292_v48  ;;  %v932_v14 = vadd.f32 %v3707_v37, %v3703_v41  ;;  %v1089_v35 = vadd.f32 %v1088_v38, %v928_v50  ;;  %v1092_v48 = vpop.f32.mrf.mxu0  ;;  %v4206_v41 = vld [vmem:[#allocation36_spill] sm:$0xff] }
 0x206   :  { %v1385_v1 = vrot.slane %v1280_v33, 1  ;;  %v1691_v24 = vrot.slane %v1280_v33, 2  ;;  %v1281_v56 = vmax.f32 %v1232_v5, 0.0  ;;  %v1236_v20 = vadd.f32 %v1235_v25, %v1075_v32  ;;  %2205 = vmatprep.subr.mxu0 %v1307_v52 }
 0x207   :  { %v1237_v46 = vpop.f32.mrf.mxu1  ;;  %2206 = vmatpush3.msra.mxu0 %v1291_v12  ;;  %v934_v33 = vadd.f32 %v4206_v41, %v3697_v63  ;;  %v1093_v25 = vadd.f32 %v1092_v48, %v932_v14  ;;  %v4207_v48 = vld [vmem:[#allocation4_spill] sm:$0xff]  ;;  %v4209_v41 = vld [vmem:[#allocation6_spill] sm:$0xff] }
 0x208   :  { %v1388_v51 = vrot.slane %v1281_v56, 1  ;;  %v1694_v29 = vrot.slane %v1281_v56, 2  ;;  %v1238_v6 = vadd.f32 %v1237_v46, %v1077_v49  ;;  %v1386_v55 = vsel %vm375_vm1, %v1384_v16, %v1385_v1  ;;  %2207 = vmatprep.subr.mxu0 %v1306_v26  ;;  %v1094_v16 = vpop.f32.mrf.mxu0 }
 0x209   :  { %v1241_v11 = vpop.f32.mrf.mxu1  ;;  %v1692_v18 = vsel %vm432_vm3, %v1690_v8, %v1691_v24  ;;  %2208 = vmatpush3.msra.mxu0 %v1290_v45  ;;  %v3986_v40 = vmax.f32 %v1236_v20, 0.0  ;;  %v1087_v49 = vadd.f32 %v1086_v22, %v926_v21  ;;  %v1095_v45 = vadd.f32 %v1094_v16, %v934_v33  ;;  %v4210_v33 = vld [vmem:[#allocation7_spill] sm:$0xff] }
 0x20a   :  { %v1242_v62 = vadd.f32 %v1241_v11, %v1081_v3  ;;  %v1389_v60 = vsel %vm375_vm1, %v1387_v30, %v1388_v51  ;;  %v1695_v53 = vsel %vm432_vm3, %v1693_v15, %v1694_v29  ;;  %2233 = vmatprep.subr.mxu0 %v4205_v9  ;;  %v3991_v13 = vmax.f32 %v1238_v6, 0.0  ;;  %v4230_v16 = vld [vmem:[#allocation27_spill] sm:$0xff] }
 0x20b   :  { %v1243_v34 = vpop.f32.mrf.mxu1  ;;  %1539 = vmatprep.mubr.f32.mxu0 %v1389_v60  ;;  %1845 = vmatprep.mubr.f32.mxu1 %v1695_v53  ;;  %v1390_v12 = vrot.slane %v3986_v40, 1  ;;  %v1696_v36 = vrot.slane %v3986_v40, 2 }
 0x20c   :  { %v1284_v0 = vmax.f32 %v1242_v62, 0.0  ;;  %v1244_v39 = vadd.f32 %v1243_v34, %v1083_v61  ;;  %1540 = vmatmul.mubr.f32.gmra.mxu0 %v1386_v55  ;;  %1846 = vmatmul.mubr.f32.gmra.mxu1 %v1692_v18  ;;  %v1393_v24 = vrot.slane %v3991_v13, 1  ;;  %v1699_v8 = vrot.slane %v3991_v13, 2 }
 0x20d   :  { %v1247_v37 = vpop.f32.mrf.mxu1 }
 0x20e   :  { %v1391_v5 = vrot.slane %v1284_v0, 1  ;;  %v1697_v52 = vrot.slane %v1284_v0, 2  ;;  %v1285_v32 = vmax.f32 %v1244_v39, 0.0  ;;  %v1248_v20 = vadd.f32 %v1247_v37, %v1087_v49  ;;  %v4208_v37 = vld [vmem:[#allocation5_spill] sm:$0xff]  ;;  %v4215_v49 = vld [vmem:[#allocation12_spill] sm:$0xff] }
 0x20f   :  { %v1249_v1 = vpop.f32.mrf.mxu1 }
 0x210   :  { %v1394_v56 = vrot.slane %v1285_v32, 1  ;;  %v1700_v26 = vrot.slane %v1285_v32, 2  ;;  %v1250_v3 = vadd.f32 %v1249_v1, %v1089_v35  ;;  %v1392_v46 = vsel %vm375_vm1, %v1390_v12, %v1391_v5  ;;  %v4211_v5 = vld [vmem:[#allocation8_spill] sm:$0xff]  ;;  %v4213_v32 = vld [vmem:[#allocation10_spill] sm:$0xff]  ;;  %v4220_v1 = vld [vmem:[#allocation17_spill] sm:$0xff] }
 0x211   :  { %v1253_v63 = vpop.f32.mrf.mxu1  ;;  %v1698_v22 = vsel %vm432_vm3, %v1696_v36, %v1697_v52  ;;  %v4005_v11 = vmax.f32 %v1248_v20, 0.0  ;;  %v4212_v52 = vld [vmem:[#allocation9_spill] sm:$0xff]  ;;  %v4217_v12 = vld [vmem:[#allocation14_spill] sm:$0xff]  ;;  %v4219_v36 = vld [vmem:[#allocation16_spill] sm:$0xff]  ;;  %v1661_v20 = vrot.slane %v1260_v27, 2 }
 0x212   :  { %v1254_v50 = vadd.f32 %v1253_v63, %v1093_v25  ;;  %v1395_v29 = vsel %vm375_vm1, %v1393_v24, %v1394_v56  ;;  %v1701_v6 = vsel %vm432_vm3, %v1699_v8, %v1700_v26  ;;  %v4003_v38 = vmax.f32 %v1250_v3, 0.0  ;;  %v4216_v25 = vld [vmem:[#allocation13_spill] sm:$0xff]  ;;  %v4223_v24 = vld [vmem:[#allocation20_spill] sm:$0xff]  ;;  %v4233_v63 = vld [vmem:[#allocation30_spill] sm:$0xff] }
 0x213   :  { %v1255_v51 = vpop.f32.mrf.mxu1  ;;  %1544 = vmatprep.mubr.f32.mxu0 %v1395_v29  ;;  %1850 = vmatprep.mubr.f32.mxu1 %v1701_v6  ;;  %v1396_v60 = vrot.slane %v4005_v11, 1  ;;  %v1702_v53 = vrot.slane %v4005_v11, 2  ;;  %v4224_v56 = vld [vmem:[#allocation21_spill] sm:$0xff]  ;;  %v4227_v26 = vld [vmem:[#allocation24_spill] sm:$0xff]  ;;  %v1663_v8 = vrot.slane %v3735_v19, 2 }
 0x214   :  { %v1288_v30 = vmax.f32 %v1254_v50, 0.0  ;;  %v1256_v15 = vadd.f32 %v1255_v51, %v1095_v45  ;;  %1545 = vmatmul.mubr.f32.gmra.mxu0 %v1392_v46  ;;  %1851 = vmatmul.mubr.f32.gmra.mxu1 %v1698_v22  ;;  %v1399_v21 = vrot.slane %v4003_v38, 1  ;;  %v1705_v62 = vrot.slane %v4003_v38, 2  ;;  %v4228_v3 = vld [vmem:[#allocation25_spill] sm:$0xff]  ;;  %v4235_v46 = vld [vmem:[#allocation32_spill] sm:$0xff] }
 0x215   :  { %v4236_v22 = vld [vmem:[#allocation33_spill] sm:$0xff]  ;;  %v4239_v50 = vmov 0.0   ;;  %v1666_v51 = vrot.slane %v3780_v17, 2 }
 0x216   :  { %v1289_v55 = vmax.f32 %v1256_v15, 0.0  ;;  %v1397_v18 = vrot.slane %v1288_v30, 1  ;;  %v1703_v61 = vrot.slane %v1288_v30, 2  ;;  %v14_v30 = vstv %s4130_s8 }
 0x217   :  { %15 = vst [vmem:[#allocation2] sm:$0x1] %v14_v30 }
 0x218   :  { %v1400_v14 = vrot.slane %v1289_v55, 1  ;;  %v1706_v34 = vrot.slane %v1289_v55, 2  ;;  %v1398_v39 = vsel %vm375_vm1, %v1396_v60, %v1397_v18  ;;  %v1704_v35 = vsel %vm432_vm3, %v1702_v53, %v1703_v61 }
 0x21a   :  { %v1401_v9 = vsel %vm375_vm1, %v1399_v21, %v1400_v14  ;;  %v1707_v0 = vsel %vm432_vm3, %v1705_v62, %v1706_v34 }
 0x21b   :  { %1549 = vmatprep.mubr.f32.mxu0 %v1401_v9  ;;  %1855 = vmatprep.mubr.f32.mxu1 %v1707_v0 }
 0x21c   :  { %1550 = vmatmul.mubr.f32.gmra.mxu0 %v1398_v39  ;;  %1856 = vmatmul.mubr.f32.gmra.mxu1 %v1704_v35 }
 0x21d   :  { %1619 = vmatprep.mubr.f32.mxu0 %v3735_v19  ;;  %v4237_v19 = vmax.f32 %v3756_v57, 0.0 }
 0x21f   :  { %v1667_v45 = vrot.slane %v4237_v19, 2 }
 0x220   :  { %1620 = vmatmul.mubr.f32.vlgmr.msra.gmra.mxu0 %v3737_v54 }
 0x221   :  { %1624 = vmatprep.mubr.f32.mxu0 %v3772_v42  ;;  %2234 = vmatpush3.msra.mxu0 %v4207_v48  ;;  %v4214_v42 = vld [vmem:[#allocation11_spill] sm:$0xff] }
 0x222   :  { %2235 = vmatprep.subr.mxu0 %v4208_v37 }
 0x223   :  { %2236 = vmatpush3.msra.mxu0 %v4209_v41 }
 0x224   :  { %1625 = vmatmul.mubr.f32.gmra.mxu0 %v3780_v17  ;;  %2237 = vmatprep.subr.mxu0 %v4210_v33  ;;  %v1958_v17 = vld [vmem:[#allocation2] sm:$0x1] }
 0x225   :  { %1629 = vmatprep.mubr.f32.mxu0 %v3822_v31  ;;  %2238 = vmatpush3.msra.mxu0 %v4211_v5  ;;  %v4218_v31 = vld [vmem:[#allocation15_spill] sm:$0xff] }
 0x226   :  { %2239 = vmatprep.subr.mxu0 %v4212_v52 }
 0x227   :  { %2240 = vmatpush3.msra.mxu0 %v4213_v32 }
 0x228   :  { %1630 = vmatmul.mubr.f32.gmra.mxu0 %v3813_v4  ;;  %2241 = vmatprep.subr.mxu0 %v4214_v42  ;;  %v4221_v4 = vld [vmem:[#allocation18_spill] sm:$0xff] }
 0x229   :  { %1634 = vmatprep.mubr.f32.mxu0 %v3878_v44  ;;  %2242 = vmatpush3.msra.mxu0 %v4215_v49  ;;  %v4222_v44 = vld [vmem:[#allocation19_spill] sm:$0xff] }
 0x22a   :  { %2243 = vmatprep.subr.mxu0 %v4216_v25 }
 0x22b   :  { %2244 = vmatpush3.msra.mxu0 %v4217_v12 }
 0x22c   :  { %1635 = vmatmul.mubr.f32.gmra.mxu0 %v3861_v59  ;;  %2245 = vmatprep.subr.mxu0 %v4218_v31  ;;  %v4225_v59 = vld [vmem:[#allocation22_spill] sm:$0xff] }
 0x22d   :  { %1639 = vmatprep.mubr.f32.mxu0 %v3914_v7  ;;  %2246 = vmatpush3.msra.mxu0 %v4219_v36  ;;  %v4226_v7 = vld [vmem:[#allocation23_spill] sm:$0xff] }
 0x22e   :  { %2247 = vmatprep.subr.mxu0 %v4220_v1 }
 0x22f   :  { %2248 = vmatpush3.msra.mxu0 %v4221_v4 }
 0x230   :  { %1640 = vmatmul.mubr.f32.gmra.mxu0 %v3907_v43  ;;  %2249 = vmatprep.subr.mxu0 %v4222_v44  ;;  %v4229_v43 = vld [vmem:[#allocation26_spill] sm:$0xff] }
 0x231   :  { %1644 = vmatprep.mubr.f32.mxu0 %v3961_v47  ;;  %2250 = vmatpush3.msra.mxu0 %v4223_v24  ;;  %v1664_v47 = vrot.slane %v1261_v58, 2 }
 0x232   :  { %2251 = vmatprep.subr.mxu0 %v4224_v56 }
 0x233   :  { %2252 = vmatpush3.msra.mxu0 %v4225_v59  ;;  %v1665_v58 = vsel %vm432_vm3, %v1663_v8, %v1664_v47 }
 0x234   :  { %1645 = vmatmul.mubr.f32.gmra.mxu0 %v3949_v23  ;;  %2253 = vmatprep.subr.mxu0 %v4226_v7  ;;  %v4231_v23 = vld [vmem:[#allocation28_spill] sm:$0xff] }
 0x235   :  { %1649 = vmatprep.mubr.f32.mxu0 %v3991_v13  ;;  %2254 = vmatpush3.msra.mxu0 %v4227_v26  ;;  %v4232_v13 = vld [vmem:[#allocation29_spill] sm:$0xff] }
 0x236   :  { %2255 = vmatprep.subr.mxu0 %v4228_v3 }
 0x237   :  { %2256 = vmatpush3.msra.mxu0 %v4229_v43 }
 0x238   :  { %1650 = vmatmul.mubr.f32.gmra.mxu0 %v3986_v40  ;;  %2257 = vmatprep.subr.mxu0 %v4230_v16  ;;  %v1660_v40 = vrot.slane %v3737_v54, 2  ;;  %v1668_v54 = vsel %vm432_vm3, %v1666_v51, %v1667_v45 }
 0x239   :  { %1654 = vmatprep.mubr.f32.mxu0 %v4003_v38  ;;  %2258 = vmatpush3.msra.mxu0 %v4231_v23  ;;  %v2378_v38 = vmov 0  }
 0x23a   :  { %2259 = vmatprep.subr.mxu0 %v4232_v13  ;;  %v1662_v27 = vsel %vm432_vm3, %v1660_v40, %v1661_v20  ;;  %2375 = vset.pattern.permute.xlu0 %v2378_v38 }
 0x23b   :  { %2260 = vmatpush3.msra.mxu0 %v4233_v63  ;;  %1961 = vperm.xlu0 %2375, %v1958_v17  }
 0x23c   :  { %1655 = vmatmul.mubr.f32.gmra.mxu0 %v4005_v11  ;;  %2261 = vmatprep.subr.mxu0 %v4234_v28 }
 0x23d   :  { %2262 = vmatpush3.msra.mxu0 %v4235_v46  ;;  %1820 = vmatprep.mubr.f32.mxu0 %v1665_v58  ;;  %v4093_v58 = vld [vmem:[%s4131_s6] ss:$0 sm:$0xff] }
 0x23e   :  { %2263 = vmatprep.subr.mxu0 %v4236_v22 }
 0x23f   :  { %2264 = vmatpush3.msra.mxu0 %v4238_v10 }
 0x240   :  { %1821 = vmatmul.mubr.f32.vlgmr.msra.gmra.mxu0 %v1662_v27  ;;  %2335 = vmatprep.subr.mxu0 %v4239_v50 }
 0x241   :  { %1825 = vmatprep.mubr.f32.mxu0 %v3820_v2 }
 0x244   :  { %1826 = vmatmul.mubr.f32.gmra.mxu0 %v1668_v54 }
 0x245   :  { %2337 = vmatprep.mubr.msk.f32.mxu0 %vm2377_vm5, %v4239_v50 }
 0x2a4   :  { %v2153_v29 = vpop.f32.mrf.mxu0 }
 0x2a6   :  { %v2154_v57 = vpop.f32.mrf.mxu0 }
 0x2a7   :  { %v4077_v6 = vadd.f32 %v2154_v57, %v2153_v29 }
 0x2ac   :  { %v4082_v2 = vpop.f32.mrf.mxu0 }
 0x2ae   :  { %v4084_v15 = vpop.f32.mrf.mxu0 }
 0x2b4   :  { %v2159_v11 = vpop.f32.mrf.mxu0  ;;  %v2271_v9 = vpop.f32.mrf.mxu1 }
 0x2b6   :  { %v2160_v55 = vpop.f32.mrf.mxu0  ;;  %v2272_v35 = vpop.f32.mrf.mxu1 }
 0x2b7   :  { %v2161_v4 = vadd.f32 %v2160_v55, %v2159_v11  ;;  %v2273_v3 = vadd.f32 %v2272_v35, %v2271_v9 }
 0x2bc   :  { %v2162_v18 = vpop.f32.mrf.mxu0  ;;  %v2274_v37 = vpop.f32.mrf.mxu1 }
 0x2be   :  { %v2163_v61 = vpop.f32.mrf.mxu0  ;;  %v2275_v5 = vpop.f32.mrf.mxu1 }
 0x2bf   :  { %v2164_v56 = vadd.f32 %v2163_v61, %v2162_v18  ;;  %v2276_v13 = vadd.f32 %v2275_v5, %v2274_v37 }
 0x2c4   :  { %v2165_v21 = vpop.f32.mrf.mxu0  ;;  %v2277_v32 = vpop.f32.mrf.mxu1 }
 0x2c6   :  { %v2166_v62 = vpop.f32.mrf.mxu0  ;;  %v2278_v25 = vpop.f32.mrf.mxu1 }
 0x2c7   :  { %v2167_v43 = vadd.f32 %v2166_v62, %v2165_v21  ;;  %v2279_v28 = vadd.f32 %v2278_v25, %v2277_v32 }
 0x2cc   :  { %v2168_v14 = vpop.f32.mrf.mxu0  ;;  %v2280_v31 = vpop.f32.mrf.mxu1 }
 0x2ce   :  { %v2169_v34 = vpop.f32.mrf.mxu0  ;;  %v2281_v59 = vpop.f32.mrf.mxu1 }
 0x2cf   :  { %v2170_v46 = vadd.f32 %v2169_v34, %v2168_v14  ;;  %v2282_v50 = vadd.f32 %v2281_v59, %v2280_v31 }
 0x2d4   :  { %v2171_v60 = vpop.f32.mrf.mxu0  ;;  %v2283_v47 = vpop.f32.mrf.mxu1 }
 0x2d6   :  { %v2172_v53 = vpop.f32.mrf.mxu0  ;;  %v2284_v22 = vpop.f32.mrf.mxu1 }
 0x2d7   :  { %v2173_v38 = vadd.f32 %v2172_v53, %v2171_v60  ;;  %v2285_v61 = vadd.f32 %v2284_v22, %v2283_v47 }
 0x2dc   :  { %v2174_v0 = vpop.f32.mrf.mxu0  ;;  %v2286_v51 = vpop.f32.mrf.mxu1 }
 0x2de   :  { %v2175_v39 = vpop.f32.mrf.mxu0  ;;  %v2287_v21 = vpop.f32.mrf.mxu1 }
 0x2df   :  { %v2176_v37 = vadd.f32 %v2175_v39, %v2174_v0  ;;  %v2288_v53 = vadd.f32 %v2287_v21, %v2286_v51 }
 0x2e0   :  { %v2209_v48 = vpop.f32.mrf.mxu0 }
 0x2e2   :  { %v2210_v41 = vpop.f32.mrf.mxu0 }
 0x2e3   :  { %v2211_v9 = vadd.f32 %v2210_v41, %v2209_v48 }
 0x2e4   :  { %v4086_v33 = vpop.f32.mrf.mxu0 }
 0x2e6   :  { %v4088_v52 = vpop.f32.mrf.mxu0 }
 0x2e7   :  { %v2214_v48 = vadd.f32 %v4088_v52, %v4086_v33 }
 0x2e8   :  { %v2215_v42 = vpop.f32.mrf.mxu0 }
 0x2ea   :  { %v2216_v49 = vpop.f32.mrf.mxu0 }
 0x2eb   :  { %v2217_v36 = vadd.f32 %v2216_v49, %v2215_v42 }
 0x2ec   :  { %v2218_v12 = vpop.f32.mrf.mxu0 }
 0x2ed   :  { %v1632_v7 = vadd.f32 %v2217_v36, %v2161_v4 }
 0x2ee   :  { %v2219_v1 = vpop.f32.mrf.mxu0 }
 0x2ef   :  { %v2220_v44 = vadd.f32 %v2219_v1, %v2218_v12  ;;  %v1863_v20 = vadd.f32 %v2273_v3, %v1632_v7  ;;  %v1622_v1 = vadd.f32 %v2211_v9, %v4077_v6 }
 0x2f0   :  { %v2221_v24 = vpop.f32.mrf.mxu0 }
 0x2f1   :  { %v1637_v16 = vadd.f32 %v2220_v44, %v2164_v56  ;;  %v1878_v54 = vadd.f32 %v4093_v58, %v1863_v20 }
 0x2f2   :  { %v2222_v26 = vpop.f32.mrf.mxu0 }
 0x2f3   :  { %v2223_v23 = vadd.f32 %v2222_v26, %v2221_v24  ;;  %v1864_v19 = vadd.f32 %v2276_v13, %v1637_v16  ;;  %v1886_v62 = vmax.f32 %v1878_v54, 0.0  ;;  %v2158_v24 = vadd.f32 %v4084_v15, %v4082_v2 }
 0x2f4   :  { %v2224_v8 = vpop.f32.mrf.mxu0 }
 0x2f5   :  { %v1642_v63 = vadd.f32 %v2223_v23, %v2167_v43  ;;  %v1879_v30 = vadd.f32 %v4093_v58, %v1864_v19  ;;  %v1907_v25 = vsel %vm1892_vm6, %v1886_v62, 0.0  ;;  %v1627_v43 = vadd.f32 %v2214_v48, %v2158_v24 }
 0x2f6   :  { %v2225_v40 = vpop.f32.mrf.mxu0  ;;  %v1908_v56 = vrot.slane %v1907_v25, 4 }
 0x2f7   :  { %v2226_v45 = vadd.f32 %v2225_v40, %v2224_v8  ;;  %v1865_v10 = vadd.f32 %v2279_v28, %v1642_v63  ;;  %v1887_v5 = vmax.f32 %v1879_v30, 0.0 }
 0x2f8   :  { %v2227_v27 = vpop.f32.mrf.mxu0  ;;  %v1909_v2 = vadd.f32 %v1908_v56, %v1907_v25 }
 0x2f9   :  { %v1647_v29 = vadd.f32 %v2226_v45, %v2170_v46  ;;  %v1880_v55 = vadd.f32 %v4093_v58, %v1865_v10  ;;  %v1914_v0 = vsel %vm1892_vm6, %v1887_v5, 0.0 }
 0x2fa   :  { %v2228_v57 = vpop.f32.mrf.mxu0  ;;  %v1915_v33 = vrot.slane %v1914_v0, 4  ;;  %v1910_v51 = vrot.slane %v1909_v2, 2 }
 0x2fb   :  { %v1866_v17 = vadd.f32 %v2282_v50, %v1647_v29  ;;  %v2229_v11 = vadd.f32 %v2228_v57, %v2227_v27  ;;  %v1888_v42 = vmax.f32 %v1880_v55, 0.0 }
 0x2fc   :  { %v2230_v18 = vpop.f32.mrf.mxu0  ;;  %v1916_v46 = vadd.f32 %v1915_v33, %v1914_v0  ;;  %v1911_v21 = vadd.f32 %v1910_v51, %v1909_v2 }
 0x2fd   :  { %v1881_v14 = vadd.f32 %v4093_v58, %v1866_v17  ;;  %v1652_v34 = vadd.f32 %v2229_v11, %v2173_v38  ;;  %v1921_v59 = vsel %vm1892_vm6, %v1888_v42, 0.0 }
 0x2fe   :  { %v2231_v35 = vpop.f32.mrf.mxu0  ;;  %v1922_v16 = vrot.slane %v1921_v59, 4  ;;  %v1917_v57 = vrot.slane %v1916_v46, 2 }
 0x2ff   :  { %v1867_v32 = vadd.f32 %v2285_v61, %v1652_v34  ;;  %v2232_v60 = vadd.f32 %v2231_v35, %v2230_v18  ;;  %v1889_v12 = vmax.f32 %v1881_v14, 0.0 }
 0x300   :  { %v2265_v49 = vpop.f32.mrf.mxu0  ;;  %v1923_v19 = vadd.f32 %v1922_v16, %v1921_v59  ;;  %v1918_v14 = vadd.f32 %v1917_v57, %v1916_v46 }
 0x301   :  { %v1882_v31 = vadd.f32 %v4093_v58, %v1867_v32  ;;  %v1657_v36 = vadd.f32 %v2232_v60, %v2176_v37  ;;  %v1928_v26 = vsel %vm1892_vm6, %v1889_v12, 0.0  ;;  %v1912_v60 = vrot.slane %v1911_v21, 1 }
 0x302   :  { %v2266_v41 = vpop.f32.mrf.mxu0  ;;  %v1929_v15 = vrot.slane %v1928_v26, 4  ;;  %v1924_v17 = vrot.slane %v1923_v19, 2  ;;  %v1919_v42 = vrot.slane %v1918_v14, 1 }
 0x303   :  { %v1890_v39 = vmax.f32 %v1882_v31, 0.0  ;;  %v1868_v4 = vadd.f32 %v2288_v53, %v1657_v36  ;;  %v2267_v44 = vadd.f32 %v2266_v41, %v2265_v49  ;;  %v1913_v48 = vadd.f32 %v1912_v60, %v1911_v21 }
 0x304   :  { %v2268_v7 = vpop.f32.mrf.mxu0  ;;  %v1930_v27 = vadd.f32 %v1929_v15, %v1928_v26  ;;  %v1925_v35 = vadd.f32 %v1924_v17, %v1923_v19  ;;  %v1920_v0 = vadd.f32 %v1919_v42, %v1918_v14 }
 0x305   :  { %v1883_v6 = vadd.f32 %v4093_v58, %v1868_v4  ;;  %v1861_v3 = vadd.f32 %v2267_v44, %v1622_v1  ;;  %v1935_v52 = vsel %vm1892_vm6, %v1890_v39, 0.0 }
 0x306   :  { %v2269_v47 = vpop.f32.mrf.mxu0  ;;  %v1936_v20 = vrot.slane %v1935_v52, 4  ;;  %v1931_v55 = vrot.slane %v1930_v27, 2  ;;  %v1926_v12 = vrot.slane %v1925_v35, 1 }
 0x307   :  { %v1891_v23 = vmax.f32 %v1883_v6, 0.0  ;;  %v1876_v8 = vadd.f32 %v4093_v58, %v1861_v3  ;;  %v2270_v13 = vadd.f32 %v2269_v47, %v2268_v7  ;;  %v1951_v7 = vmul.f32 0.33333334, %v1913_v48 }
 0x308   :  { %v1937_v54 = vadd.f32 %v1936_v20, %v1935_v52  ;;  %v1932_v37 = vadd.f32 %v1931_v55, %v1930_v27  ;;  %v1927_v44 = vadd.f32 %v1926_v12, %v1925_v35  ;;  %v1952_v6 = vmul.f32 0.33333334, %v1920_v0 }
 0x309   :  { %v1942_v63 = vsel %vm1892_vm6, %v1891_v23, 0.0  ;;  %v1884_v28 = vmax.f32 %v1876_v8, 0.0  ;;  %v1862_v40 = vadd.f32 %v2270_v13, %v1627_v43 }
 0x30a   :  { %v1943_v22 = vrot.slane %v1942_v63, 4  ;;  %v1938_v62 = vrot.slane %v1937_v54, 2  ;;  %v1933_v31 = vrot.slane %v1932_v37, 1  ;;  %v1953_v33 = vmul.f32 0.33333334, %v1927_v44 }
 0x30b   :  { %v1893_v45 = vsel %vm1892_vm6, %v1884_v28, 0.0  ;;  %v1877_v10 = vadd.f32 %v4093_v58, %v1862_v40  ;;  %v1962_v28 = vpop.permute.xlu0 %1961  ;;  %v4240_v40 = vld [vmem:[#allocation35_spill] sm:$0xff] }
 0x30c   :  { %v1894_v50 = vrot.slane %v1893_v45, 4  ;;  %v1944_v38 = vadd.f32 %v1943_v22, %v1942_v63  ;;  %v1939_v53 = vadd.f32 %v1938_v62, %v1937_v54  ;;  %v1934_v59 = vadd.f32 %v1933_v31, %v1932_v37  ;;  %v1957_v63 = vld [vmem:[%s4132_s7] sm:$0x1] }
 0x30d   :  { %v1885_v29 = vmax.f32 %v1877_v10, 0.0  ;;  %v4241_v46 = vsub.s32 0, %v4240_v40 }
 0x30e   :  { %v1895_v30 = vadd.f32 %v1894_v50, %v1893_v45  ;;  %v1945_v34 = vrot.slane %v1944_v38, 2  ;;  %v1940_v41 = vrot.slane %v1939_v53, 1  ;;  %v1954_v47 = vmul.f32 0.33333334, %v1934_v59 }
 0x30f   :  { %v1900_v11 = vsel %vm1892_vm6, %v1885_v29, 0.0  ;;  %v1967_v22 = vrot.slane %v1962_v28, %v4241_v46 }
 0x310   :  { %v1896_v18 = vrot.slane %v1895_v30, 2  ;;  %v1901_v61 = vrot.slane %v1900_v11, 4  ;;  %v1946_v25 = vadd.f32 %v1945_v34, %v1944_v38  ;;  %v1941_v26 = vadd.f32 %v1940_v41, %v1939_v53 }
 0x312   :  { %v1897_v9 = vadd.f32 %v1896_v18, %v1895_v30  ;;  %v1902_v58 = vadd.f32 %v1901_v61, %v1900_v11  ;;  %v1947_v4 = vrot.slane %v1946_v25, 1  ;;  %v1955_v23 = vmul.f32 0.33333334, %v1941_v26 }
 0x314   :  { %v1898_v5 = vrot.slane %v1897_v9, 1  ;;  %v1903_v32 = vrot.slane %v1902_v58, 2  ;;  %v1948_v3 = vadd.f32 %v1947_v4, %v1946_v25 }
 0x316   :  { %v1904_v49 = vadd.f32 %v1903_v32, %v1902_v58  ;;  %v1899_v36 = vadd.f32 %v1898_v5, %v1897_v9  ;;  %v1956_v13 = vmul.f32 0.33333334, %v1948_v3 }
 0x318   :  { %v1905_v1 = vrot.slane %v1904_v49, 1  ;;  %v1949_v24 = vmul.f32 0.33333334, %v1899_v36 }
 0x31a   :  { %v1906_v39 = vadd.f32 %v1905_v1, %v1904_v49 }
 0x31c   :  { %v1950_v56 = vmul.f32 0.33333334, %v1906_v39 }
 0x31e   :  { %v1977_v43 = vsel %vm1976_vm7, %v1950_v56, %v1949_v24 }
 0x31f   :  { %v1979_v52 = vsel %vm1978_vm8, %v1951_v7, %v1977_v43 }
 0x320   :  { %v1981_v16 = vsel %vm1980_vm9, %v1952_v6, %v1979_v52 }
 0x321   :  { %v1983_v8 = vsel %vm1982_vm10, %v1953_v33, %v1981_v16 }
 0x322   :  { %v1985_v2 = vsel %vm1984_vm11, %v1954_v47, %v1983_v8 }
 0x323   :  { %v1987_v15 = vsel %vm1986_vm12, %v1955_v23, %v1985_v2 }
 0x324   :  { %v1989_v20 = vsel %vm1988_vm13, %v1956_v13, %v1987_v15 }
 0x325   :  { %2336 = vmatpush3.xpose.msra.mxu0 %v1989_v20 }
 0x328   :  { %2338 = vmatmul.mubr.f32.vlgmr.msra.gmra.mxu0 %v1957_v63 }
 0x3e8   :  { %v2057_v19 = vpop.f32.mrf.mxu0 }
 0x3e9   :  { %v2058_v45 = vadd.f32 %v2057_v19, %v1967_v22 }
 0x3ea   :  { %v2339_v10 = vpop.f32.mrf.mxu0 }
 0x3eb   :  { %2062 = vst.msk [vmem:[%s4133_s9] sm:$0x1] %vm2061_vm14, %v2058_v45 }

</bundles_post_ra>
